<compile_context>
chip_gen: v7x
topology: tpu7x:2x2x1
jax: 0.10.0
libtpu: 0.0.40
codegen_flags: <defaults>
</compile_context>

<pallas_src>
import functools

import numpy as np
import jax
import jax.numpy as jnp
from jax.experimental import pallas as pl
from jax.experimental.pallas import tpu as pltpu


# -----------------------------------------------------------------------------
# Kernel
# -----------------------------------------------------------------------------
def _forward_kernel(emb_ref, reg_ref,
                    wc_ref, bc_ref,
                    wada_ref, bada_ref,
                    wm1_ref, bm1_ref, wm2_ref, bm2_ref,
                    wh1_ref, bh1_ref, wh2_ref, bh2_ref, wh3_ref, bh3_ref,
                    out_ref,
                    *, depth, num_mixtures, input_dim):
    f32 = jnp.float32
    bf16 = jnp.bfloat16
    TB = emb_ref.shape[0]
    D = reg_ref.shape[1]
    NM, ID = num_mixtures, input_dim
    n_mu = NM * ID
    n_chunks = 3 * depth + 2
    CH = wada_ref.shape[1] // n_chunks          # lane-padded adaLN chunk stride (>=128)

    def gelu(z):
        # tanh-approx GELU (EUP tanh); <= ~1e-3 relative deviation from the exact
        # erf form used by nn.GELU() (documented / accepted).
        c = np.float32(np.sqrt(2.0 / np.pi))
        return 0.5 * z * (1.0 + jnp.tanh(c * (z + np.float32(0.044715) * (z * z * z))))

    def silu(z):
        return z / (1.0 + jnp.exp(-z))          # z * sigmoid(z), exp/divide only

    def layer_norm(z):                           # elementwise_affine=False, eps=1e-5
        m = jnp.mean(z, axis=-1, keepdims=True)
        v = jnp.mean((z - m) ** 2, axis=-1, keepdims=True)
        return (z - m) * jax.lax.rsqrt(v + 1e-5)

    def linear(a, w, b):
        # bf16 MXU operands (weights already bf16 from pack time), f32 accumulate.
        return jnp.dot(a.astype(bf16), w, preferred_element_type=f32) + b

    # cond = cond_mapper(emb); silu(cond) feeds every adaLN projection.
    cond = linear(emb_ref[...], wc_ref[...], bc_ref[...])            # (TB, D)
    silu_cond = silu(cond)

    # Fused adaLN projection: ONE matmul covers every block's ada_map plus the
    # final_adaln.  Each D-wide chunk is padded to CH (>=128) lanes at pack time,
    # so all slices below start on a lane boundary.
    ada_all = linear(silu_cond, wada_ref[...], bada_ref[...])        # (TB, n_chunks*CH)

    # LN of the register row computed once: LN(broadcast(r)) == broadcast(LN(r)).
    reg = reg_ref[...]                                               # (1, D)
    ln_reg = layer_norm(reg)                                         # (1, D)

    x = None
    for d in range(depth):
        g0 = (3 * d + 0) * CH
        m0 = (3 * d + 1) * CH
        s0 = (3 * d + 2) * CH
        gamma = ada_all[:, g0:g0 + D]
        mu_a = ada_all[:, m0:m0 + D]
        sigma = ada_all[:, s0:s0 + D]
        ln_x = ln_reg if d == 0 else layer_norm(x)
        x_res = (1.0 + gamma) * ln_x + mu_a                          # (TB, D)
        h = gelu(linear(x_res, wm1_ref[d], bm1_ref[d]))              # (TB, expansion*D)
        delta = linear(h, wm2_ref[d], bm2_ref[d]) * sigma            # (TB, D)
        x = (reg + delta) if d == 0 else (x + delta)
    if x is None:                                                    # depth == 0 fallback
        x = jnp.broadcast_to(reg, (TB, D))

    # Final adaLN (its projection lives in the trailing two CH-wide chunks).
    f0 = 3 * depth * CH
    x = (1.0 + ada_all[:, f0:f0 + D]) * layer_norm(x) + ada_all[:, f0 + CH:f0 + CH + D]

    # Fused heads: shared-input layer-1 concatenated along N; layers 2/3 are
    # block-diagonal so the mu / kappa / weights paths remain independent.
    h1 = gelu(linear(x, wh1_ref[...], bh1_ref[...]))                 # (TB, 6D)
    h2 = linear(h1, wh2_ref[...], bh2_ref[...])                      # (TB, 3D) (FusedMLP: no act after fc2)
    raw = linear(h2, wh3_ref[...], bh3_ref[...])                     # (TB, OUT_W>=128), lane-padded
    # Lane layout of raw: [ mu(0:n_mu) | kappa(n_mu:n_mu+NM) | logits(..:n_mu+2NM) | 0 pad ]

    lane = jax.lax.broadcasted_iota(jnp.int32, raw.shape, 1)

    # mu: per-mixture L2 normalization with exact f32 lane-masked reductions; the
    # results stay on the lanes they already occupy (no shuffles, no gmat matmul).
    sq = raw * raw
    inv_norm = jnp.ones_like(raw)
    for g in range(NM):
        in_g = (lane >= g * ID) & (lane < (g + 1) * ID)
        ss = jnp.sum(jnp.where(in_g, sq, 0.0), axis=-1, keepdims=True)   # (TB, 1)
        inv_norm = jnp.where(in_g, jax.lax.rsqrt(ss + 1e-12), inv_norm)
    mu_n = raw * inv_norm

    # kappa: softplus (always >= 0), stable form using only exp/log.
    kap_sp = jnp.maximum(raw, 0.0) + jnp.log(1.0 + jnp.exp(-jnp.abs(raw)))

    # mixture weights: softmax over the NM logit lanes with an EXACT divide so the
    # weights sum to 1 to f32 roundoff (torch.softmax parity).
    is_logit = (lane >= n_mu + NM) & (lane < n_mu + 2 * NM)
    logits_m = jnp.where(is_logit, raw, -1e30)
    mmax = jnp.max(logits_m, axis=-1, keepdims=True)
    e = jnp.exp(logits_m - mmax)                  # exactly 0 on non-logit lanes
    wts = e / jnp.sum(e, axis=-1, keepdims=True)

    # Lane-blend (no concatenate / lane shifts) + single lane-dense unmasked store.
    out = jnp.where(lane < n_mu, mu_n,
          jnp.where(lane < n_mu + NM, kap_sp,
          jnp.where(is_logit, wts, 0.0)))
    out_ref[...] = out


# -----------------------------------------------------------------------------
# Wrapper
# -----------------------------------------------------------------------------
def geo_forward(emb, packed_params, *, depth, num_mixtures, input_dim):
    B, cond_dim = emb.shape
    n_mu = num_mixtures * input_dim
    out_w = n_mu + 2 * num_mixtures
    out_w_pad = max(128, ((out_w + 127) // 128) * 128)

    assert B % 8 == 0, "batch must be a multiple of 8 ((8,128) tile constraint)"
    # grid=1 for small/medium batches (no per-step overhead on single-TC v5e/v6e,
    # fills the MXU M dimension); split big batches in two so v7x's dual
    # TensorCores each execute exactly one step.  Weights are <1 MiB and live
    # intermediates ~2.5 KB/row, so VMEM is not the limiter at these sizes.
    if B > 256 and B % 2 == 0 and (B // 2) % 8 == 0:
        TB = B // 2
    else:
        TB = B
    assert B % TB == 0

    def param_spec(p):
        zeros = (0,) * p.ndim
        # Constant index_map: the block never changes across grid steps, so the
        # weights stay resident in VMEM (no re-DMA per step).
        return pl.BlockSpec(p.shape, lambda i, _z=zeros: _z)

    in_specs = [pl.BlockSpec((TB, cond_dim), lambda i: (i, 0))] + \
               [param_spec(p) for p in packed_params]

    kernel = functools.partial(_forward_kernel, depth=depth,
                               num_mixtures=num_mixtures, input_dim=input_dim)

    out = pl.pallas_call(
        kernel,
        out_shape=jax.ShapeDtypeStruct((B, out_w_pad), jnp.float32),
        grid=(B // TB,),
        in_specs=in_specs,
        out_specs=pl.BlockSpec((TB, out_w_pad), lambda i: (i, 0)),
        compiler_params=pltpu.CompilerParams(dimension_semantics=("parallel",)),
    )(emb, *packed_params)

    mu = out[:, :n_mu].reshape(B, num_mixtures, input_dim)           # PyTorch layout
    kappa = out[:, n_mu:n_mu + num_mixtures]
    weights = out[:, n_mu + num_mixtures:n_mu + 2 * num_mixtures]
    return mu, kappa, weights


# -----------------------------------------------------------------------------
# Deterministic synthetic parameters (shapes follow the module's __init__)
# -----------------------------------------------------------------------------
def init_params(key, *, input_dim, dim, depth, expansion, cond_dim, num_mixtures):
    keys = iter(jax.random.split(key, 32))

    def w(shape, fan_in):
        return jax.random.normal(next(keys), shape, jnp.float32) / np.sqrt(fan_in)

    def b(shape):
        return 0.01 * jax.random.normal(next(keys), shape, jnp.float32)

    hid = dim * expansion
    reg = 0.02 * jax.random.truncated_normal(next(keys), -2.0, 2.0, (1, dim), jnp.float32)

    raw = [
        reg,                                                          # init_registers (1, dim)
        w((cond_dim, dim), cond_dim), b((1, dim)),                    # cond_mapper
        w((depth, dim, 3 * dim), dim), b((depth, 1, 3 * dim)),        # blocks: ada_map linear
        w((depth, dim, hid), dim), b((depth, 1, hid)),                # blocks: mlp fc1
        w((depth, hid, dim), hid), b((depth, 1, dim)),                # blocks: mlp fc2
        w((dim, 2 * dim), dim), b((1, 2 * dim)),                      # final_adaln linear
        # mu_predictor: FusedMLP(mult=2) + Linear(dim -> input_dim*num_mixtures)
        w((dim, 2 * dim), dim), b((1, 2 * dim)),
        w((2 * dim, dim), 2 * dim), b((1, dim)),
        w((dim, num_mixtures * input_dim), dim), b((1, num_mixtures * input_dim)),
        # kappa_predictor: FusedMLP(mult=2) + Linear(dim -> num_mixtures) + Softplus
        w((dim, 2 * dim), dim), b((1, 2 * dim)),
        w((2 * dim, dim), 2 * dim), b((1, dim)),
        w((dim, num_mixtures), dim), b((1, num_mixtures)),
        # mixture_weights: FusedMLP(mult=2) + Linear(dim -> num_mixtures) + Softmax
        w((dim, 2 * dim), dim), b((1, 2 * dim)),
        w((2 * dim, dim), 2 * dim), b((1, dim)),
        w((dim, num_mixtures), dim), b((1, num_mixtures)),
    ]
    return raw


def pack_params(raw, *, input_dim, dim, depth, num_mixtures, lane=128):
    """Fuse / pad / bf16-cast weights once, outside the kernel."""
    (reg, wc, bc,
     wada, bada, wm1, bm1, wm2, bm2,
     wfa, bfa,
     wmu1, bmu1, wmu2, bmu2, wmu3, bmu3,
     wk1, bk1, wk2, bk2, wk3, bk3,
     ww1, bw1, ww2, bw2, ww3, bw3) = raw
    f32, bf16 = jnp.float32, jnp.bfloat16

    # adaLN chunk stride: each D-wide gamma/mu/sigma chunk padded to a lane multiple
    # so every in-kernel slice starts on a 128-lane boundary.
    ch = max(lane, ((dim + lane - 1) // lane) * lane)

    def pad_chunk(a):                      # (rows, dim) -> (rows, ch)
        return jnp.pad(a, ((0, 0), (0, ch - dim)))

    # Fused adaLN projection: [blk0 g|m|s, blk1 g|m|s, ..., final g|m], chunk-padded.
    w_chunks, b_chunks = [], []
    for d in range(depth):
        for c in range(3):
            w_chunks.append(pad_chunk(wada[d][:, c * dim:(c + 1) * dim]))
            b_chunks.append(pad_chunk(bada[d][:, c * dim:(c + 1) * dim]))
    for c in range(2):
        w_chunks.append(pad_chunk(wfa[:, c * dim:(c + 1) * dim]))
        b_chunks.append(pad_chunk(bfa[:, c * dim:(c + 1) * dim]))
    w_ada_all = jnp.concatenate(w_chunks, axis=1)
    b_ada_all = jnp.concatenate(b_chunks, axis=1)

    # Head layer-1 fusion (all three heads consume the same x).
    w_h1 = jnp.concatenate([wmu1, wk1, ww1], axis=1)                  # (dim, 6*dim)
    b_h1 = jnp.concatenate([bmu1, bk1, bw1], axis=1)

    # Head layer-2: block-diagonal so the heads stay independent.
    hid = 2 * dim
    w_h2 = jnp.zeros((3 * hid, 3 * dim), f32)
    w_h2 = w_h2.at[0 * hid:1 * hid, 0 * dim:1 * dim].set(wmu2)
    w_h2 = w_h2.at[1 * hid:2 * hid, 1 * dim:2 * dim].set(wk2)
    w_h2 = w_h2.at[2 * hid:3 * hid, 2 * dim:3 * dim].set(ww2)
    b_h2 = jnp.concatenate([bmu2, bk2, bw2], axis=1)

    # Head layer-3: block-diagonal, N zero-padded to a lane multiple (>=128).
    n_mu = num_mixtures * input_dim
    out_w = n_mu + 2 * num_mixtures
    out_w_pad = max(lane, ((out_w + lane - 1) // lane) * lane)
    w_h3 = jnp.zeros((3 * dim, out_w_pad), f32)
    w_h3 = w_h3.at[0 * dim:1 * dim, 0:n_mu].set(wmu3)
    w_h3 = w_h3.at[1 * dim:2 * dim, n_mu:n_mu + num_mixtures].set(wk3)
    w_h3 = w_h3.at[2 * dim:3 * dim, n_mu + num_mixtures:out_w].set(ww3)
    b_h3 = jnp.zeros((1, out_w_pad), f32)
    b_h3 = b_h3.at[:, 0:n_mu].set(bmu3)
    b_h3 = b_h3.at[:, n_mu:n_mu + num_mixtures].set(bk3)
    b_h3 = b_h3.at[:, n_mu + num_mixtures:out_w].set(bw3)

    # Weights -> bf16 (MXU-native operands); biases / registers stay f32 (f32 accumulate).
    wcast = lambda a: a.astype(bf16)
    return [reg.astype(f32),
            wcast(wc), bc,
            wcast(w_ada_all), b_ada_all,
            wcast(wm1), bm1, wcast(wm2), bm2,
            wcast(w_h1), b_h1, wcast(w_h2), b_h2, wcast(w_h3), b_h3]


# -----------------------------------------------------------------------------
# Main
# -----------------------------------------------------------------------------
if __name__ == "__main__":
    INPUT_DIM = 3       # points on S^2 (von Mises-Fisher means)
    DIM = 64
    DEPTH = 2
    EXPANSION = 2
    COND_DIM = 32
    NUM_MIXTURES = 3
    B = 8

    key = jax.random.PRNGKey(0)
    kp, ke = jax.random.split(key)
    raw_params = init_params(kp, input_dim=INPUT_DIM, dim=DIM, depth=DEPTH,
                             expansion=EXPANSION, cond_dim=COND_DIM,
                             num_mixtures=NUM_MIXTURES)
    packed = pack_params(raw_params, input_dim=INPUT_DIM, dim=DIM, depth=DEPTH,
                         num_mixtures=NUM_MIXTURES)
    emb = jax.random.normal(ke, (B, COND_DIM), jnp.float32)   # batch['emb']

    mu, kappa, weights = geo_forward(emb, packed, depth=DEPTH,
                                     num_mixtures=NUM_MIXTURES, input_dim=INPUT_DIM)
    jax.block_until_ready((mu, kappa, weights))

    assert mu.shape == (B, NUM_MIXTURES, INPUT_DIM)
    assert kappa.shape == (B, NUM_MIXTURES)
    assert weights.shape == (B, NUM_MIXTURES)
    assert bool(jnp.all(jnp.isfinite(mu)))
    assert bool(jnp.all(jnp.isfinite(kappa)))
    assert bool(jnp.all(jnp.isfinite(weights)))
    assert bool(jnp.all(kappa >= 0.0))
    # exact softmax divide -> weights sum to 1 to f32 roundoff
    assert bool(jnp.allclose(jnp.sum(weights, axis=-1), 1.0, atol=1e-4))
    # exact f32 sum-of-squares + rsqrt -> unit-norm mixture means
    assert bool(jnp.allclose(jnp.linalg.norm(mu, axis=-1), 1.0, atol=1e-3))

    print("KERNEL_OK")
</pallas_src>

<mosaic_0001>
module attributes {stable_mosaic.version = 11 : i64} {
  func.func @_forward_kernel(%arg0: i32, %arg1: memref<8x32xf32, #tpu.memory_space<vmem>>, %arg2: memref<1x64xf32, #tpu.memory_space<vmem>>, %arg3: memref<32x64xbf16, #tpu.memory_space<vmem>>, %arg4: memref<1x64xf32, #tpu.memory_space<vmem>>, %arg5: memref<64x1024xbf16, #tpu.memory_space<vmem>>, %arg6: memref<1x1024xf32, #tpu.memory_space<vmem>>, %arg7: memref<2x64x128xbf16, #tpu.memory_space<vmem>>, %arg8: memref<2x1x128xf32, #tpu.memory_space<vmem>>, %arg9: memref<2x128x64xbf16, #tpu.memory_space<vmem>>, %arg10: memref<2x1x64xf32, #tpu.memory_space<vmem>>, %arg11: memref<64x384xbf16, #tpu.memory_space<vmem>>, %arg12: memref<1x384xf32, #tpu.memory_space<vmem>>, %arg13: memref<384x192xbf16, #tpu.memory_space<vmem>>, %arg14: memref<1x192xf32, #tpu.memory_space<vmem>>, %arg15: memref<192x128xbf16, #tpu.memory_space<vmem>>, %arg16: memref<1x128xf32, #tpu.memory_space<vmem>>, %arg17: memref<8x128xf32, #tpu.memory_space<vmem>>) attributes {dimension_semantics = [#tpu.dimension_semantics<parallel>], iteration_bounds = array<i64: 1>, scalar_prefetch = 0 : i64, scratch_operands = 0 : i64, tpu.core_type = #tpu.core_type<tc>, window_params = [{transform_indices = @transform_0, window_bounds = array<i64: 8, 32>}, {pipeline_mode = #tpu.pipeline_mode<synchronous>, transform_indices = @transform_1, window_bounds = array<i64: 1, 64>}, {pipeline_mode = #tpu.pipeline_mode<synchronous>, transform_indices = @transform_2, window_bounds = array<i64: 32, 64>}, {pipeline_mode = #tpu.pipeline_mode<synchronous>, transform_indices = @transform_3, window_bounds = array<i64: 1, 64>}, {pipeline_mode = #tpu.pipeline_mode<synchronous>, transform_indices = @transform_4, window_bounds = array<i64: 64, 1024>}, {pipeline_mode = #tpu.pipeline_mode<synchronous>, transform_indices = @transform_5, window_bounds = array<i64: 1, 1024>}, {pipeline_mode = #tpu.pipeline_mode<synchronous>, transform_indices = @transform_6, window_bounds = array<i64: 2, 64, 128>}, {pipeline_mode = #tpu.pipeline_mode<synchronous>, transform_indices = @transform_7, window_bounds = array<i64: 2, 1, 128>}, {pipeline_mode = #tpu.pipeline_mode<synchronous>, transform_indices = @transform_8, window_bounds = array<i64: 2, 128, 64>}, {pipeline_mode = #tpu.pipeline_mode<synchronous>, transform_indices = @transform_9, window_bounds = array<i64: 2, 1, 64>}, {pipeline_mode = #tpu.pipeline_mode<synchronous>, transform_indices = @transform_10, window_bounds = array<i64: 64, 384>}, {pipeline_mode = #tpu.pipeline_mode<synchronous>, transform_indices = @transform_11, window_bounds = array<i64: 1, 384>}, {pipeline_mode = #tpu.pipeline_mode<synchronous>, transform_indices = @transform_12, window_bounds = array<i64: 384, 192>}, {pipeline_mode = #tpu.pipeline_mode<synchronous>, transform_indices = @transform_13, window_bounds = array<i64: 1, 192>}, {pipeline_mode = #tpu.pipeline_mode<synchronous>, transform_indices = @transform_14, window_bounds = array<i64: 192, 128>}, {pipeline_mode = #tpu.pipeline_mode<synchronous>, transform_indices = @transform_15, window_bounds = array<i64: 1, 128>}, {transform_indices = @transform_16, window_bounds = array<i64: 8, 128>}]} {
    %c0 = arith.constant 0 : index
    %c0_0 = arith.constant 0 : index
    %0 = vector.load %arg1[%c0, %c0_0] : memref<8x32xf32, #tpu.memory_space<vmem>>, vector<8x32xf32>
    %c0_1 = arith.constant 0 : index
    %c0_2 = arith.constant 0 : index
    %1 = vector.load %arg3[%c0_1, %c0_2] : memref<32x64xbf16, #tpu.memory_space<vmem>>, vector<32x64xbf16>
    %c0_3 = arith.constant 0 : index
    %c0_4 = arith.constant 0 : index
    %2 = vector.load %arg4[%c0_3, %c0_4] : memref<1x64xf32, #tpu.memory_space<vmem>>, vector<1x64xf32>
    %3 = arith.truncf %0 : vector<8x32xf32> to vector<8x32xbf16>
    %cst = arith.constant dense<0.000000e+00> : vector<8x64xf32>
    %4 = tpu.matmul %3, %1, %cst {dimension_numbers = #tpu.dot_dimension_numbers<[1], [0], [0], [1], [0, 0, 1, 1], [], []>} : vector<8x32xbf16>, vector<32x64xbf16>, vector<8x64xf32> -> vector<8x64xf32>
    %5 = vector.broadcast %2 : vector<1x64xf32> to vector<8x64xf32>
    %6 = arith.addf %4, %5 : vector<8x64xf32>
    %cst_5 = arith.constant 0.000000e+00 : f32
    %7 = vector.broadcast %cst_5 : f32 to vector<8x64xf32>
    %8 = arith.subf %7, %6 : vector<8x64xf32>
    %9 = math.exp %8 : vector<8x64xf32>
    %cst_6 = arith.constant 1.000000e+00 : f32
    %10 = vector.broadcast %cst_6 : f32 to vector<8x64xf32>
    %11 = arith.addf %10, %9 : vector<8x64xf32>
    %12 = arith.divf %6, %11 : vector<8x64xf32>
    %c0_7 = arith.constant 0 : index
    %c0_8 = arith.constant 0 : index
    %13 = vector.load %arg5[%c0_7, %c0_8] : memref<64x1024xbf16, #tpu.memory_space<vmem>>, vector<64x1024xbf16>
    %c0_9 = arith.constant 0 : index
    %c0_10 = arith.constant 0 : index
    %14 = vector.load %arg6[%c0_9, %c0_10] : memref<1x1024xf32, #tpu.memory_space<vmem>>, vector<1x1024xf32>
    %15 = arith.truncf %12 : vector<8x64xf32> to vector<8x64xbf16>
    %cst_11 = arith.constant dense<0.000000e+00> : vector<8x1024xf32>
    %16 = tpu.matmul %15, %13, %cst_11 {dimension_numbers = #tpu.dot_dimension_numbers<[1], [0], [0], [1], [0, 0, 1, 1], [], []>} : vector<8x64xbf16>, vector<64x1024xbf16>, vector<8x1024xf32> -> vector<8x1024xf32>
    %17 = vector.broadcast %14 : vector<1x1024xf32> to vector<8x1024xf32>
    %18 = arith.addf %16, %17 : vector<8x1024xf32>
    %c0_12 = arith.constant 0 : index
    %c0_13 = arith.constant 0 : index
    %19 = vector.load %arg2[%c0_12, %c0_13] : memref<1x64xf32, #tpu.memory_space<vmem>>, vector<1x64xf32>
    %cst_14 = arith.constant dense<0.000000e+00> : vector<1xf32>
    %20 = vector.multi_reduction <add>, %19, %cst_14 [1] : vector<1x64xf32> to vector<1xf32>
    %21 = vector.shape_cast %20 : vector<1xf32> to vector<1x1xf32>
    %cst_15 = arith.constant 6.400000e+01 : f32
    %22 = vector.broadcast %cst_15 : f32 to vector<1x1xf32>
    %23 = arith.divf %21, %22 : vector<1x1xf32>
    %24 = vector.broadcast %23 : vector<1x1xf32> to vector<1x64xf32>
    %25 = arith.subf %19, %24 : vector<1x64xf32>
    %26 = arith.mulf %25, %25 : vector<1x64xf32>
    %cst_16 = arith.constant dense<0.000000e+00> : vector<1xf32>
    %27 = vector.multi_reduction <add>, %26, %cst_16 [1] : vector<1x64xf32> to vector<1xf32>
    %28 = vector.shape_cast %27 : vector<1xf32> to vector<1x1xf32>
    %cst_17 = arith.constant 6.400000e+01 : f32
    %29 = vector.broadcast %cst_17 : f32 to vector<1x1xf32>
    %30 = arith.divf %28, %29 : vector<1x1xf32>
    %31 = vector.broadcast %23 : vector<1x1xf32> to vector<1x64xf32>
    %32 = arith.subf %19, %31 : vector<1x64xf32>
    %cst_18 = arith.constant 9.99999974E-6 : f32
    %33 = vector.broadcast %cst_18 : f32 to vector<1x1xf32>
    %34 = arith.addf %30, %33 : vector<1x1xf32>
    %35 = math.rsqrt %34 : vector<1x1xf32>
    %36 = vector.broadcast %35 : vector<1x1xf32> to vector<1x64xf32>
    %37 = arith.mulf %32, %36 : vector<1x64xf32>
    %38 = vector.extract_strided_slice %18 {offsets = [0, 0], sizes = [8, 64], strides = [1, 1]} : vector<8x1024xf32> to vector<8x64xf32>
    %39 = vector.extract_strided_slice %18 {offsets = [0, 128], sizes = [8, 64], strides = [1, 1]} : vector<8x1024xf32> to vector<8x64xf32>
    %40 = vector.extract_strided_slice %18 {offsets = [0, 256], sizes = [8, 64], strides = [1, 1]} : vector<8x1024xf32> to vector<8x64xf32>
    %cst_19 = arith.constant 1.000000e+00 : f32
    %41 = vector.broadcast %cst_19 : f32 to vector<8x64xf32>
    %42 = arith.addf %41, %38 : vector<8x64xf32>
    %43 = vector.broadcast %37 : vector<1x64xf32> to vector<8x64xf32>
    %44 = arith.mulf %42, %43 : vector<8x64xf32>
    %45 = arith.addf %44, %39 : vector<8x64xf32>
    %c0_20 = arith.constant 0 : index
    %c0_21 = arith.constant 0 : index
    %c0_22 = arith.constant 0 : index
    %46 = vector.load %arg7[%c0_20, %c0_21, %c0_22] : memref<2x64x128xbf16, #tpu.memory_space<vmem>>, vector<1x64x128xbf16>
    %47 = vector.shape_cast %46 : vector<1x64x128xbf16> to vector<64x128xbf16>
    %c0_23 = arith.constant 0 : index
    %c0_24 = arith.constant 0 : index
    %c0_25 = arith.constant 0 : index
    %48 = vector.load %arg8[%c0_23, %c0_24, %c0_25] : memref<2x1x128xf32, #tpu.memory_space<vmem>>, vector<1x1x128xf32>
    %49 = vector.shape_cast %48 : vector<1x1x128xf32> to vector<1x128xf32>
    %50 = arith.truncf %45 : vector<8x64xf32> to vector<8x64xbf16>
    %cst_26 = arith.constant dense<0.000000e+00> : vector<8x128xf32>
    %51 = tpu.matmul %50, %47, %cst_26 {dimension_numbers = #tpu.dot_dimension_numbers<[1], [0], [0], [1], [0, 0, 1, 1], [], []>} : vector<8x64xbf16>, vector<64x128xbf16>, vector<8x128xf32> -> vector<8x128xf32>
    %52 = vector.broadcast %49 : vector<1x128xf32> to vector<8x128xf32>
    %53 = arith.addf %51, %52 : vector<8x128xf32>
    %cst_27 = arith.constant 5.000000e-01 : f32
    %54 = vector.broadcast %cst_27 : f32 to vector<8x128xf32>
    %55 = arith.mulf %54, %53 : vector<8x128xf32>
    %56 = arith.mulf %53, %53 : vector<8x128xf32>
    %57 = arith.mulf %56, %53 : vector<8x128xf32>
    %cst_28 = arith.constant 4.471500e-02 : f32
    %58 = vector.broadcast %cst_28 : f32 to vector<8x128xf32>
    %59 = arith.mulf %58, %57 : vector<8x128xf32>
    %60 = arith.addf %53, %59 : vector<8x128xf32>
    %cst_29 = arith.constant 0.797884583 : f32
    %61 = vector.broadcast %cst_29 : f32 to vector<8x128xf32>
    %62 = arith.mulf %61, %60 : vector<8x128xf32>
    %63 = math.tanh %62 : vector<8x128xf32>
    %cst_30 = arith.constant 1.000000e+00 : f32
    %64 = vector.broadcast %cst_30 : f32 to vector<8x128xf32>
    %65 = arith.addf %64, %63 : vector<8x128xf32>
    %66 = arith.mulf %55, %65 : vector<8x128xf32>
    %c0_31 = arith.constant 0 : index
    %c0_32 = arith.constant 0 : index
    %c0_33 = arith.constant 0 : index
    %67 = vector.load %arg9[%c0_31, %c0_32, %c0_33] : memref<2x128x64xbf16, #tpu.memory_space<vmem>>, vector<1x128x64xbf16>
    %68 = vector.shape_cast %67 : vector<1x128x64xbf16> to vector<128x64xbf16>
    %c0_34 = arith.constant 0 : index
    %c0_35 = arith.constant 0 : index
    %c0_36 = arith.constant 0 : index
    %69 = vector.load %arg10[%c0_34, %c0_35, %c0_36] : memref<2x1x64xf32, #tpu.memory_space<vmem>>, vector<1x1x64xf32>
    %70 = vector.shape_cast %69 : vector<1x1x64xf32> to vector<1x64xf32>
    %71 = arith.truncf %66 : vector<8x128xf32> to vector<8x128xbf16>
    %cst_37 = arith.constant dense<0.000000e+00> : vector<8x64xf32>
    %72 = tpu.matmul %71, %68, %cst_37 {dimension_numbers = #tpu.dot_dimension_numbers<[1], [0], [0], [1], [0, 0, 1, 1], [], []>} : vector<8x128xbf16>, vector<128x64xbf16>, vector<8x64xf32> -> vector<8x64xf32>
    %73 = vector.broadcast %70 : vector<1x64xf32> to vector<8x64xf32>
    %74 = arith.addf %72, %73 : vector<8x64xf32>
    %75 = arith.mulf %74, %40 : vector<8x64xf32>
    %76 = vector.broadcast %19 : vector<1x64xf32> to vector<8x64xf32>
    %77 = arith.addf %76, %75 : vector<8x64xf32>
    %78 = vector.extract_strided_slice %18 {offsets = [0, 384], sizes = [8, 64], strides = [1, 1]} : vector<8x1024xf32> to vector<8x64xf32>
    %79 = vector.extract_strided_slice %18 {offsets = [0, 512], sizes = [8, 64], strides = [1, 1]} : vector<8x1024xf32> to vector<8x64xf32>
    %80 = vector.extract_strided_slice %18 {offsets = [0, 640], sizes = [8, 64], strides = [1, 1]} : vector<8x1024xf32> to vector<8x64xf32>
    %cst_38 = arith.constant dense<0.000000e+00> : vector<8xf32>
    %81 = vector.multi_reduction <add>, %77, %cst_38 [1] : vector<8x64xf32> to vector<8xf32>
    %82 = vector.shape_cast %81 : vector<8xf32> to vector<8x1xf32>
    %cst_39 = arith.constant 6.400000e+01 : f32
    %83 = vector.broadcast %cst_39 : f32 to vector<8x1xf32>
    %84 = arith.divf %82, %83 : vector<8x1xf32>
    %85 = vector.broadcast %84 : vector<8x1xf32> to vector<8x64xf32>
    %86 = arith.subf %77, %85 : vector<8x64xf32>
    %87 = arith.mulf %86, %86 : vector<8x64xf32>
    %cst_40 = arith.constant dense<0.000000e+00> : vector<8xf32>
    %88 = vector.multi_reduction <add>, %87, %cst_40 [1] : vector<8x64xf32> to vector<8xf32>
    %89 = vector.shape_cast %88 : vector<8xf32> to vector<8x1xf32>
    %cst_41 = arith.constant 6.400000e+01 : f32
    %90 = vector.broadcast %cst_41 : f32 to vector<8x1xf32>
    %91 = arith.divf %89, %90 : vector<8x1xf32>
    %92 = vector.broadcast %84 : vector<8x1xf32> to vector<8x64xf32>
    %93 = arith.subf %77, %92 : vector<8x64xf32>
    %cst_42 = arith.constant 9.99999974E-6 : f32
    %94 = vector.broadcast %cst_42 : f32 to vector<8x1xf32>
    %95 = arith.addf %91, %94 : vector<8x1xf32>
    %96 = math.rsqrt %95 : vector<8x1xf32>
    %97 = vector.broadcast %96 : vector<8x1xf32> to vector<8x64xf32>
    %98 = arith.mulf %93, %97 : vector<8x64xf32>
    %cst_43 = arith.constant 1.000000e+00 : f32
    %99 = vector.broadcast %cst_43 : f32 to vector<8x64xf32>
    %100 = arith.addf %99, %78 : vector<8x64xf32>
    %101 = arith.mulf %100, %98 : vector<8x64xf32>
    %102 = arith.addf %101, %79 : vector<8x64xf32>
    %c1 = arith.constant 1 : index
    %c0_44 = arith.constant 0 : index
    %c0_45 = arith.constant 0 : index
    %103 = vector.load %arg7[%c1, %c0_44, %c0_45] : memref<2x64x128xbf16, #tpu.memory_space<vmem>>, vector<1x64x128xbf16>
    %104 = vector.shape_cast %103 : vector<1x64x128xbf16> to vector<64x128xbf16>
    %c1_46 = arith.constant 1 : index
    %c0_47 = arith.constant 0 : index
    %c0_48 = arith.constant 0 : index
    %105 = vector.load %arg8[%c1_46, %c0_47, %c0_48] : memref<2x1x128xf32, #tpu.memory_space<vmem>>, vector<1x1x128xf32>
    %106 = vector.shape_cast %105 : vector<1x1x128xf32> to vector<1x128xf32>
    %107 = arith.truncf %102 : vector<8x64xf32> to vector<8x64xbf16>
    %cst_49 = arith.constant dense<0.000000e+00> : vector<8x128xf32>
    %108 = tpu.matmul %107, %104, %cst_49 {dimension_numbers = #tpu.dot_dimension_numbers<[1], [0], [0], [1], [0, 0, 1, 1], [], []>} : vector<8x64xbf16>, vector<64x128xbf16>, vector<8x128xf32> -> vector<8x128xf32>
    %109 = vector.broadcast %106 : vector<1x128xf32> to vector<8x128xf32>
    %110 = arith.addf %108, %109 : vector<8x128xf32>
    %cst_50 = arith.constant 5.000000e-01 : f32
    %111 = vector.broadcast %cst_50 : f32 to vector<8x128xf32>
    %112 = arith.mulf %111, %110 : vector<8x128xf32>
    %113 = arith.mulf %110, %110 : vector<8x128xf32>
    %114 = arith.mulf %113, %110 : vector<8x128xf32>
    %cst_51 = arith.constant 4.471500e-02 : f32
    %115 = vector.broadcast %cst_51 : f32 to vector<8x128xf32>
    %116 = arith.mulf %115, %114 : vector<8x128xf32>
    %117 = arith.addf %110, %116 : vector<8x128xf32>
    %cst_52 = arith.constant 0.797884583 : f32
    %118 = vector.broadcast %cst_52 : f32 to vector<8x128xf32>
    %119 = arith.mulf %118, %117 : vector<8x128xf32>
    %120 = math.tanh %119 : vector<8x128xf32>
    %cst_53 = arith.constant 1.000000e+00 : f32
    %121 = vector.broadcast %cst_53 : f32 to vector<8x128xf32>
    %122 = arith.addf %121, %120 : vector<8x128xf32>
    %123 = arith.mulf %112, %122 : vector<8x128xf32>
    %c1_54 = arith.constant 1 : index
    %c0_55 = arith.constant 0 : index
    %c0_56 = arith.constant 0 : index
    %124 = vector.load %arg9[%c1_54, %c0_55, %c0_56] : memref<2x128x64xbf16, #tpu.memory_space<vmem>>, vector<1x128x64xbf16>
    %125 = vector.shape_cast %124 : vector<1x128x64xbf16> to vector<128x64xbf16>
    %c1_57 = arith.constant 1 : index
    %c0_58 = arith.constant 0 : index
    %c0_59 = arith.constant 0 : index
    %126 = vector.load %arg10[%c1_57, %c0_58, %c0_59] : memref<2x1x64xf32, #tpu.memory_space<vmem>>, vector<1x1x64xf32>
    %127 = vector.shape_cast %126 : vector<1x1x64xf32> to vector<1x64xf32>
    %128 = arith.truncf %123 : vector<8x128xf32> to vector<8x128xbf16>
    %cst_60 = arith.constant dense<0.000000e+00> : vector<8x64xf32>
    %129 = tpu.matmul %128, %125, %cst_60 {dimension_numbers = #tpu.dot_dimension_numbers<[1], [0], [0], [1], [0, 0, 1, 1], [], []>} : vector<8x128xbf16>, vector<128x64xbf16>, vector<8x64xf32> -> vector<8x64xf32>
    %130 = vector.broadcast %127 : vector<1x64xf32> to vector<8x64xf32>
    %131 = arith.addf %129, %130 : vector<8x64xf32>
    %132 = arith.mulf %131, %80 : vector<8x64xf32>
    %133 = arith.addf %77, %132 : vector<8x64xf32>
    %134 = vector.extract_strided_slice %18 {offsets = [0, 768], sizes = [8, 64], strides = [1, 1]} : vector<8x1024xf32> to vector<8x64xf32>
    %cst_61 = arith.constant 1.000000e+00 : f32
    %135 = vector.broadcast %cst_61 : f32 to vector<8x64xf32>
    %136 = arith.addf %135, %134 : vector<8x64xf32>
    %cst_62 = arith.constant dense<0.000000e+00> : vector<8xf32>
    %137 = vector.multi_reduction <add>, %133, %cst_62 [1] : vector<8x64xf32> to vector<8xf32>
    %138 = vector.shape_cast %137 : vector<8xf32> to vector<8x1xf32>
    %cst_63 = arith.constant 6.400000e+01 : f32
    %139 = vector.broadcast %cst_63 : f32 to vector<8x1xf32>
    %140 = arith.divf %138, %139 : vector<8x1xf32>
    %141 = vector.broadcast %140 : vector<8x1xf32> to vector<8x64xf32>
    %142 = arith.subf %133, %141 : vector<8x64xf32>
    %143 = arith.mulf %142, %142 : vector<8x64xf32>
    %cst_64 = arith.constant dense<0.000000e+00> : vector<8xf32>
    %144 = vector.multi_reduction <add>, %143, %cst_64 [1] : vector<8x64xf32> to vector<8xf32>
    %145 = vector.shape_cast %144 : vector<8xf32> to vector<8x1xf32>
    %cst_65 = arith.constant 6.400000e+01 : f32
    %146 = vector.broadcast %cst_65 : f32 to vector<8x1xf32>
    %147 = arith.divf %145, %146 : vector<8x1xf32>
    %148 = vector.broadcast %140 : vector<8x1xf32> to vector<8x64xf32>
    %149 = arith.subf %133, %148 : vector<8x64xf32>
    %cst_66 = arith.constant 9.99999974E-6 : f32
    %150 = vector.broadcast %cst_66 : f32 to vector<8x1xf32>
    %151 = arith.addf %147, %150 : vector<8x1xf32>
    %152 = math.rsqrt %151 : vector<8x1xf32>
    %153 = vector.broadcast %152 : vector<8x1xf32> to vector<8x64xf32>
    %154 = arith.mulf %149, %153 : vector<8x64xf32>
    %155 = arith.mulf %136, %154 : vector<8x64xf32>
    %156 = vector.extract_strided_slice %18 {offsets = [0, 896], sizes = [8, 64], strides = [1, 1]} : vector<8x1024xf32> to vector<8x64xf32>
    %157 = arith.addf %155, %156 : vector<8x64xf32>
    %c0_67 = arith.constant 0 : index
    %c0_68 = arith.constant 0 : index
    %158 = vector.load %arg11[%c0_67, %c0_68] : memref<64x384xbf16, #tpu.memory_space<vmem>>, vector<64x384xbf16>
    %c0_69 = arith.constant 0 : index
    %c0_70 = arith.constant 0 : index
    %159 = vector.load %arg12[%c0_69, %c0_70] : memref<1x384xf32, #tpu.memory_space<vmem>>, vector<1x384xf32>
    %160 = arith.truncf %157 : vector<8x64xf32> to vector<8x64xbf16>
    %cst_71 = arith.constant dense<0.000000e+00> : vector<8x384xf32>
    %161 = tpu.matmul %160, %158, %cst_71 {dimension_numbers = #tpu.dot_dimension_numbers<[1], [0], [0], [1], [0, 0, 1, 1], [], []>} : vector<8x64xbf16>, vector<64x384xbf16>, vector<8x384xf32> -> vector<8x384xf32>
    %162 = vector.broadcast %159 : vector<1x384xf32> to vector<8x384xf32>
    %163 = arith.addf %161, %162 : vector<8x384xf32>
    %cst_72 = arith.constant 5.000000e-01 : f32
    %164 = vector.broadcast %cst_72 : f32 to vector<8x384xf32>
    %165 = arith.mulf %164, %163 : vector<8x384xf32>
    %166 = arith.mulf %163, %163 : vector<8x384xf32>
    %167 = arith.mulf %166, %163 : vector<8x384xf32>
    %cst_73 = arith.constant 4.471500e-02 : f32
    %168 = vector.broadcast %cst_73 : f32 to vector<8x384xf32>
    %169 = arith.mulf %168, %167 : vector<8x384xf32>
    %170 = arith.addf %163, %169 : vector<8x384xf32>
    %cst_74 = arith.constant 0.797884583 : f32
    %171 = vector.broadcast %cst_74 : f32 to vector<8x384xf32>
    %172 = arith.mulf %171, %170 : vector<8x384xf32>
    %173 = math.tanh %172 : vector<8x384xf32>
    %cst_75 = arith.constant 1.000000e+00 : f32
    %174 = vector.broadcast %cst_75 : f32 to vector<8x384xf32>
    %175 = arith.addf %174, %173 : vector<8x384xf32>
    %176 = arith.mulf %165, %175 : vector<8x384xf32>
    %c0_76 = arith.constant 0 : index
    %c0_77 = arith.constant 0 : index
    %177 = vector.load %arg13[%c0_76, %c0_77] : memref<384x192xbf16, #tpu.memory_space<vmem>>, vector<384x192xbf16>
    %c0_78 = arith.constant 0 : index
    %c0_79 = arith.constant 0 : index
    %178 = vector.load %arg14[%c0_78, %c0_79] : memref<1x192xf32, #tpu.memory_space<vmem>>, vector<1x192xf32>
    %179 = arith.truncf %176 : vector<8x384xf32> to vector<8x384xbf16>
    %cst_80 = arith.constant dense<0.000000e+00> : vector<8x192xf32>
    %180 = tpu.matmul %179, %177, %cst_80 {dimension_numbers = #tpu.dot_dimension_numbers<[1], [0], [0], [1], [0, 0, 1, 1], [], []>} : vector<8x384xbf16>, vector<384x192xbf16>, vector<8x192xf32> -> vector<8x192xf32>
    %181 = vector.broadcast %178 : vector<1x192xf32> to vector<8x192xf32>
    %182 = arith.addf %180, %181 : vector<8x192xf32>
    %c0_81 = arith.constant 0 : index
    %c0_82 = arith.constant 0 : index
    %183 = vector.load %arg15[%c0_81, %c0_82] : memref<192x128xbf16, #tpu.memory_space<vmem>>, vector<192x128xbf16>
    %c0_83 = arith.constant 0 : index
    %c0_84 = arith.constant 0 : index
    %184 = vector.load %arg16[%c0_83, %c0_84] : memref<1x128xf32, #tpu.memory_space<vmem>>, vector<1x128xf32>
    %185 = arith.truncf %182 : vector<8x192xf32> to vector<8x192xbf16>
    %cst_85 = arith.constant dense<0.000000e+00> : vector<8x128xf32>
    %186 = tpu.matmul %185, %183, %cst_85 {dimension_numbers = #tpu.dot_dimension_numbers<[1], [0], [0], [1], [0, 0, 1, 1], [], []>} : vector<8x192xbf16>, vector<192x128xbf16>, vector<8x128xf32> -> vector<8x128xf32>
    %187 = vector.broadcast %184 : vector<1x128xf32> to vector<8x128xf32>
    %188 = arith.addf %186, %187 : vector<8x128xf32>
    %189 = tpu.iota {dimensions = array<i32: 1>} : vector<8x128xi32>
    %190 = arith.mulf %188, %188 : vector<8x128xf32>
    %cst_86 = arith.constant 1.000000e+00 : f32
    %191 = vector.broadcast %cst_86 : f32 to vector<8x128xf32>
    %c0_i32 = arith.constant 0 : i32
    %192 = vector.broadcast %c0_i32 : i32 to vector<8x128xi32>
    %193 = arith.cmpi sge, %189, %192 : vector<8x128xi32>
    %c3_i32 = arith.constant 3 : i32
    %194 = vector.broadcast %c3_i32 : i32 to vector<8x128xi32>
    %195 = arith.cmpi slt, %189, %194 : vector<8x128xi32>
    %196 = arith.andi %193, %195 : vector<8x128xi1>
    %cst_87 = arith.constant 0.000000e+00 : f32
    %197 = vector.broadcast %cst_87 : f32 to vector<8x128xf32>
    %198 = arith.select %196, %190, %197 : vector<8x128xi1>, vector<8x128xf32>
    %cst_88 = arith.constant dense<0.000000e+00> : vector<8xf32>
    %199 = vector.multi_reduction <add>, %198, %cst_88 [1] : vector<8x128xf32> to vector<8xf32>
    %200 = vector.shape_cast %199 : vector<8xf32> to vector<8x1xf32>
    %cst_89 = arith.constant 9.99999996E-13 : f32
    %201 = vector.broadcast %cst_89 : f32 to vector<8x1xf32>
    %202 = arith.addf %200, %201 : vector<8x1xf32>
    %203 = math.rsqrt %202 : vector<8x1xf32>
    %204 = vector.shape_cast %203 : vector<8x1xf32> to vector<8x1xf32>
    %205 = vector.broadcast %204 : vector<8x1xf32> to vector<8x128xf32>
    %206 = arith.select %196, %205, %191 : vector<8x128xi1>, vector<8x128xf32>
    %c3_i32_90 = arith.constant 3 : i32
    %207 = vector.broadcast %c3_i32_90 : i32 to vector<8x128xi32>
    %208 = arith.cmpi sge, %189, %207 : vector<8x128xi32>
    %c6_i32 = arith.constant 6 : i32
    %209 = vector.broadcast %c6_i32 : i32 to vector<8x128xi32>
    %210 = arith.cmpi slt, %189, %209 : vector<8x128xi32>
    %211 = arith.andi %208, %210 : vector<8x128xi1>
    %cst_91 = arith.constant 0.000000e+00 : f32
    %212 = vector.broadcast %cst_91 : f32 to vector<8x128xf32>
    %213 = arith.select %211, %190, %212 : vector<8x128xi1>, vector<8x128xf32>
    %cst_92 = arith.constant dense<0.000000e+00> : vector<8xf32>
    %214 = vector.multi_reduction <add>, %213, %cst_92 [1] : vector<8x128xf32> to vector<8xf32>
    %215 = vector.shape_cast %214 : vector<8xf32> to vector<8x1xf32>
    %cst_93 = arith.constant 9.99999996E-13 : f32
    %216 = vector.broadcast %cst_93 : f32 to vector<8x1xf32>
    %217 = arith.addf %215, %216 : vector<8x1xf32>
    %218 = math.rsqrt %217 : vector<8x1xf32>
    %219 = vector.shape_cast %218 : vector<8x1xf32> to vector<8x1xf32>
    %220 = vector.broadcast %219 : vector<8x1xf32> to vector<8x128xf32>
    %221 = arith.select %211, %220, %206 : vector<8x128xi1>, vector<8x128xf32>
    %c6_i32_94 = arith.constant 6 : i32
    %222 = vector.broadcast %c6_i32_94 : i32 to vector<8x128xi32>
    %223 = arith.cmpi sge, %189, %222 : vector<8x128xi32>
    %c9_i32 = arith.constant 9 : i32
    %224 = vector.broadcast %c9_i32 : i32 to vector<8x128xi32>
    %225 = arith.cmpi slt, %189, %224 : vector<8x128xi32>
    %226 = arith.andi %223, %225 : vector<8x128xi1>
    %cst_95 = arith.constant 0.000000e+00 : f32
    %227 = vector.broadcast %cst_95 : f32 to vector<8x128xf32>
    %228 = arith.select %226, %190, %227 : vector<8x128xi1>, vector<8x128xf32>
    %cst_96 = arith.constant dense<0.000000e+00> : vector<8xf32>
    %229 = vector.multi_reduction <add>, %228, %cst_96 [1] : vector<8x128xf32> to vector<8xf32>
    %230 = vector.shape_cast %229 : vector<8xf32> to vector<8x1xf32>
    %cst_97 = arith.constant 9.99999996E-13 : f32
    %231 = vector.broadcast %cst_97 : f32 to vector<8x1xf32>
    %232 = arith.addf %230, %231 : vector<8x1xf32>
    %233 = math.rsqrt %232 : vector<8x1xf32>
    %234 = vector.shape_cast %233 : vector<8x1xf32> to vector<8x1xf32>
    %235 = vector.broadcast %234 : vector<8x1xf32> to vector<8x128xf32>
    %236 = arith.select %226, %235, %221 : vector<8x128xi1>, vector<8x128xf32>
    %237 = arith.mulf %188, %236 : vector<8x128xf32>
    %cst_98 = arith.constant 0.000000e+00 : f32
    %238 = vector.broadcast %cst_98 : f32 to vector<8x128xf32>
    %239 = arith.maximumf %188, %238 : vector<8x128xf32>
    %240 = math.absf %188 : vector<8x128xf32>
    %cst_99 = arith.constant 0.000000e+00 : f32
    %241 = vector.broadcast %cst_99 : f32 to vector<8x128xf32>
    %242 = arith.subf %241, %240 : vector<8x128xf32>
    %243 = math.exp %242 : vector<8x128xf32>
    %cst_100 = arith.constant 1.000000e+00 : f32
    %244 = vector.broadcast %cst_100 : f32 to vector<8x128xf32>
    %245 = arith.addf %244, %243 : vector<8x128xf32>
    %246 = math.log %245 : vector<8x128xf32>
    %247 = arith.addf %239, %246 : vector<8x128xf32>
    %c12_i32 = arith.constant 12 : i32
    %248 = vector.broadcast %c12_i32 : i32 to vector<8x128xi32>
    %249 = arith.cmpi sge, %189, %248 : vector<8x128xi32>
    %c15_i32 = arith.constant 15 : i32
    %250 = vector.broadcast %c15_i32 : i32 to vector<8x128xi32>
    %251 = arith.cmpi slt, %189, %250 : vector<8x128xi32>
    %252 = arith.andi %249, %251 : vector<8x128xi1>
    %cst_101 = arith.constant -1.000000e+30 : f32
    %253 = vector.broadcast %cst_101 : f32 to vector<8x128xf32>
    %254 = arith.select %252, %188, %253 : vector<8x128xi1>, vector<8x128xf32>
    %cst_102 = arith.constant dense<0xFF800000> : vector<8xf32>
    %255 = vector.multi_reduction <maximumf>, %254, %cst_102 [1] : vector<8x128xf32> to vector<8xf32>
    %256 = vector.shape_cast %255 : vector<8xf32> to vector<8x1xf32>
    %257 = vector.broadcast %256 : vector<8x1xf32> to vector<8x128xf32>
    %258 = arith.subf %254, %257 : vector<8x128xf32>
    %259 = math.exp %258 : vector<8x128xf32>
    %cst_103 = arith.constant dense<0.000000e+00> : vector<8xf32>
    %260 = vector.multi_reduction <add>, %259, %cst_103 [1] : vector<8x128xf32> to vector<8xf32>
    %261 = vector.shape_cast %260 : vector<8xf32> to vector<8x1xf32>
    %262 = vector.broadcast %261 : vector<8x1xf32> to vector<8x128xf32>
    %263 = arith.divf %259, %262 : vector<8x128xf32>
    %c9_i32_104 = arith.constant 9 : i32
    %264 = vector.broadcast %c9_i32_104 : i32 to vector<8x128xi32>
    %265 = arith.cmpi slt, %189, %264 : vector<8x128xi32>
    %c12_i32_105 = arith.constant 12 : i32
    %266 = vector.broadcast %c12_i32_105 : i32 to vector<8x128xi32>
    %267 = arith.cmpi slt, %189, %266 : vector<8x128xi32>
    %cst_106 = arith.constant 0.000000e+00 : f32
    %268 = vector.broadcast %cst_106 : f32 to vector<8x128xf32>
    %269 = arith.select %252, %263, %268 : vector<8x128xi1>, vector<8x128xf32>
    %270 = arith.select %267, %247, %269 : vector<8x128xi1>, vector<8x128xf32>
    %271 = arith.select %265, %237, %270 : vector<8x128xi1>, vector<8x128xf32>
    %c0_107 = arith.constant 0 : index
    %c0_108 = arith.constant 0 : index
    %272 = vector.load %arg17[%c0_107, %c0_108] : memref<8x128xf32, #tpu.memory_space<vmem>>, vector<8x128xf32>
    tpu.vector_store %arg17[%c0_107, %c0_108], %271 {strides = array<i32>} : memref<8x128xf32, #tpu.memory_space<vmem>>, vector<8x128xf32>,
    return
  }
  func.func @transform_0(%arg0: i32) -> (i32, i32) {
    %c0_i32 = arith.constant 0 : i32
    %c0_i32_0 = arith.constant 0 : i32
    return %arg0, %c0_i32 : i32, i32
  }
  func.func @transform_1(%arg0: i32) -> (i32, i32) {
    %c0_i32 = arith.constant 0 : i32
    %c0_i32_0 = arith.constant 0 : i32
    %c0_i32_1 = arith.constant 0 : i32
    return %c0_i32, %c0_i32_0 : i32, i32
  }
  func.func @transform_2(%arg0: i32) -> (i32, i32) {
    %c0_i32 = arith.constant 0 : i32
    %c0_i32_0 = arith.constant 0 : i32
    %c0_i32_1 = arith.constant 0 : i32
    return %c0_i32, %c0_i32_0 : i32, i32
  }
  func.func @transform_3(%arg0: i32) -> (i32, i32) {
    %c0_i32 = arith.constant 0 : i32
    %c0_i32_0 = arith.constant 0 : i32
    %c0_i32_1 = arith.constant 0 : i32
    return %c0_i32, %c0_i32_0 : i32, i32
  }
  func.func @transform_4(%arg0: i32) -> (i32, i32) {
    %c0_i32 = arith.constant 0 : i32
    %c0_i32_0 = arith.constant 0 : i32
    %c0_i32_1 = arith.constant 0 : i32
    return %c0_i32, %c0_i32_0 : i32, i32
  }
  func.func @transform_5(%arg0: i32) -> (i32, i32) {
    %c0_i32 = arith.constant 0 : i32
    %c0_i32_0 = arith.constant 0 : i32
    %c0_i32_1 = arith.constant 0 : i32
    return %c0_i32, %c0_i32_0 : i32, i32
  }
  func.func @transform_6(%arg0: i32) -> (i32, i32, i32) {
    %c0_i32 = arith.constant 0 : i32
    %c0_i32_0 = arith.constant 0 : i32
    %c0_i32_1 = arith.constant 0 : i32
    %c0_i32_2 = arith.constant 0 : i32
    return %c0_i32, %c0_i32_0, %c0_i32_1 : i32, i32, i32
  }
  func.func @transform_7(%arg0: i32) -> (i32, i32, i32) {
    %c0_i32 = arith.constant 0 : i32
    %c0_i32_0 = arith.constant 0 : i32
    %c0_i32_1 = arith.constant 0 : i32
    %c0_i32_2 = arith.constant 0 : i32
    return %c0_i32, %c0_i32_0, %c0_i32_1 : i32, i32, i32
  }
  func.func @transform_8(%arg0: i32) -> (i32, i32, i32) {
    %c0_i32 = arith.constant 0 : i32
    %c0_i32_0 = arith.constant 0 : i32
    %c0_i32_1 = arith.constant 0 : i32
    %c0_i32_2 = arith.constant 0 : i32
    return %c0_i32, %c0_i32_0, %c0_i32_1 : i32, i32, i32
  }
  func.func @transform_9(%arg0: i32) -> (i32, i32, i32) {
    %c0_i32 = arith.constant 0 : i32
    %c0_i32_0 = arith.constant 0 : i32
    %c0_i32_1 = arith.constant 0 : i32
    %c0_i32_2 = arith.constant 0 : i32
    return %c0_i32, %c0_i32_0, %c0_i32_1 : i32, i32, i32
  }
  func.func @transform_10(%arg0: i32) -> (i32, i32) {
    %c0_i32 = arith.constant 0 : i32
    %c0_i32_0 = arith.constant 0 : i32
    %c0_i32_1 = arith.constant 0 : i32
    return %c0_i32, %c0_i32_0 : i32, i32
  }
  func.func @transform_11(%arg0: i32) -> (i32, i32) {
    %c0_i32 = arith.constant 0 : i32
    %c0_i32_0 = arith.constant 0 : i32
    %c0_i32_1 = arith.constant 0 : i32
    return %c0_i32, %c0_i32_0 : i32, i32
  }
  func.func @transform_12(%arg0: i32) -> (i32, i32) {
    %c0_i32 = arith.constant 0 : i32
    %c0_i32_0 = arith.constant 0 : i32
    %c0_i32_1 = arith.constant 0 : i32
    return %c0_i32, %c0_i32_0 : i32, i32
  }
  func.func @transform_13(%arg0: i32) -> (i32, i32) {
    %c0_i32 = arith.constant 0 : i32
    %c0_i32_0 = arith.constant 0 : i32
    %c0_i32_1 = arith.constant 0 : i32
    return %c0_i32, %c0_i32_0 : i32, i32
  }
  func.func @transform_14(%arg0: i32) -> (i32, i32) {
    %c0_i32 = arith.constant 0 : i32
    %c0_i32_0 = arith.constant 0 : i32
    %c0_i32_1 = arith.constant 0 : i32
    return %c0_i32, %c0_i32_0 : i32, i32
  }
  func.func @transform_15(%arg0: i32) -> (i32, i32) {
    %c0_i32 = arith.constant 0 : i32
    %c0_i32_0 = arith.constant 0 : i32
    %c0_i32_1 = arith.constant 0 : i32
    return %c0_i32, %c0_i32_0 : i32, i32
  }
  func.func @transform_16(%arg0: i32) -> (i32, i32) {
    %c0_i32 = arith.constant 0 : i32
    %c0_i32_0 = arith.constant 0 : i32
    return %arg0, %c0_i32 : i32, i32
  }
}

</mosaic_0001>

<bundles_post_ra>
// kernel: tpu_custom_call.1
= control target key start
LH: loop header
LB: loop body
LE: loop exit
PB: predicated region body
PF: predicated region fallthrough
CT: control target
= control target key end

     0   :  { %s3026_s0 = inlined_call_operand.vmem [shape: f32[8,32], index: 0, kind: input, shape index: {}]   ;;  %s3027_s1 = inlined_call_operand.vmem [shape: f32[1,64], index: 1, kind: input, shape index: {}]   ;;  %s3028_s2 = inlined_call_operand.vmem [shape: bf16[32,64], index: 2, kind: input, shape index: {}]   ;;  %s3029_s3 = inlined_call_operand.vmem [shape: f32[1,64], index: 3, kind: input, shape index: {}]   ;;  %s3030_s4 = inlined_call_operand.vmem [shape: bf16[64,1024], index: 4, kind: input, shape index: {}]   ;;  %s3031_s5 = inlined_call_operand.vmem [shape: f32[1,1024], index: 5, kind: input, shape index: {}]   ;;  %s3032_s6 = inlined_call_operand.vmem [shape: bf16[2,64,128], index: 6, kind: input, shape index: {}]   ;;  %s3033_s7 = inlined_call_operand.vmem [shape: f32[2,1,128], index: 7, kind: input, shape index: {}]   ;;  %s3034_s8 = inlined_call_operand.vmem [shape: bf16[2,128,64], index: 8, kind: input, shape index: {}]   ;;  %s3035_s9 = inlined_call_operand.vmem [shape: f32[2,1,64], index: 9, kind: input, shape index: {}]   ;;  %s3036_s10 = inlined_call_operand.vmem [shape: bf16[64,384], index: 10, kind: input, shape index: {}]   ;;  %s3037_s11 = inlined_call_operand.vmem [shape: f32[1,384], index: 11, kind: input, shape index: {}]   ;;  %s3038_s12 = inlined_call_operand.vmem [shape: bf16[384,192], index: 12, kind: input, shape index: {}]   ;;  %s3039_s13 = inlined_call_operand.vmem [shape: f32[1,192], index: 13, kind: input, shape index: {}]   ;;  %s3040_s14 = inlined_call_operand.vmem [shape: bf16[192,128], index: 14, kind: input, shape index: {}]   ;;  %s3041_s15 = inlined_call_operand.vmem [shape: f32[1,128], index: 15, kind: input, shape index: {}]   ;;  %s3042_s16 = inlined_call_operand.hbm [shape: f32[8,128], index: 16, kind: output, shape index: {}]  }
   0x1   :  { %3043 = sst [smem:[#allocation5_spill]] %s3026_s0 }
   0x2   :  { %v2404_v0 = vld [vmem:[%s3027_s1] sm:$0x1]  ;;  %vm534_vm0 = vcmask 516096   ;;  %v2312_v2 = vmov 0.0   ;;  %v2129_v4 = vld [vmem:[%s3028_s2 + $0x8] sm:$0xff]   ;;  %s3044_s1 = sld [smem:[#allocation5_spill]] }
   0x3   :  { %v535_v1 = vsel %vm534_vm0, %v2404_v0, 0.0  ;;  %2034 = vmatprep.subr.bf16.mxu0 %v2312_v2  ;;  %v2128_v3 = vld [vmem:[%s3028_s2] sm:$0xff]   ;;  %vm2313_vm1 = vmmov 0   ;;  %vm80_vm2 = vcmask 261120  }
   0x4   :  { %536 = vadd.xlane.f32.xlu0 %v535_v1  ;;  %2035 = vmatpush3.bf16.msra.mxu0 %v2128_v3 }
   0x5   :  { %2038 = vmatprep.mubr.msk.bf16.mxu0 %vm2313_vm1, %v2312_v2  ;;  %2036 = vmatprep.subr.bf16.mxu0 %v2312_v2 }
   0x8   :  { %v55_v5 = vld [vmem:[%s3044_s1] sm:$0xff]  ;;  %2037 = vmatpush3.bf16.msra.mxu0 %v2129_v4 }
   0x9   :  { %v61_v6 = vpack.c.bf16 %v55_v5, %v55_v5 }
   0xb   :  { %2039 = vmatmul.mubr.msk.bf16.vlgmr.msra.gmra.mrb[0].mxu0 %vm80_vm2, %v61_v6 }
   0xc   :  { %21 = vsyncpa [#allocation3], 0  ;;  %v130_v7 = vld [vmem:[%s3030_s4] sm:$0xff]  ;;  %v132_v10 = vld [vmem:[%s3030_s4 + $0x10] sm:$0xff]  ;;  %v2314_v43 = vmov 0   ;;  %vm365_vm3 = vcmask 523264  }
   0xd   :  { %v134_v8 = vld [vmem:[%s3030_s4 + $0x20] sm:$0xff]  ;;  %v136_v11 = vld [vmem:[%s3030_s4 + $0x30] sm:$0xff]  ;;  %v131_v39 = vld [vmem:[%s3030_s4 + $0x8] sm:$0xff]  ;;  %401 = vmatprep.mubr.bf16.mxu0 %v2314_v43  ;;  %483 = vmatprep.mubr.bf16.mxu1 %v2314_v43 }
   0xe   :  { %v1831_v9 = vcombine.high %v130_v7, %v134_v8  ;;  %v1830_v12 = vcombine.low %v130_v7, %v134_v8  ;;  %v1835_v13 = vcombine.high %v132_v10, %v136_v11  ;;  %v1834_v14 = vcombine.low %v132_v10, %v136_v11  ;;  %v138_v15 = vld [vmem:[%s3030_s4 + $0x40] sm:$0xff]  ;;  %v140_v18 = vld [vmem:[%s3030_s4 + $0x50] sm:$0xff]  ;;  %v135_v40 = vld [vmem:[%s3030_s4 + $0x28] sm:$0xff] }
   0xf   :  { %v142_v16 = vld [vmem:[%s3030_s4 + $0x60] sm:$0xff]  ;;  %v144_v19 = vld [vmem:[%s3030_s4 + $0x70] sm:$0xff]  ;;  %v1833_v41 = vcombine.high %v131_v39, %v135_v40  ;;  %v1832_v42 = vcombine.low %v131_v39, %v135_v40  ;;  %v139_v60 = vld [vmem:[%s3030_s4 + $0x48] sm:$0xff] }
  0x10   :  { %369 = vmatprep.subr.bf16.mxu0 %v1831_v9  ;;  %451 = vmatprep.subr.bf16.mxu1 %v1835_v13  ;;  %v1839_v17 = vcombine.high %v138_v15, %v142_v16  ;;  %v1838_v20 = vcombine.low %v138_v15, %v142_v16  ;;  %v1843_v21 = vcombine.high %v140_v18, %v144_v19  ;;  %v146_v23 = vld [vmem:[%s3030_s4 + $0x80] sm:$0xff]  ;;  %v148_v26 = vld [vmem:[%s3030_s4 + $0x90] sm:$0xff]  ;;  %v143_v61 = vld [vmem:[%s3030_s4 + $0x68] sm:$0xff] }
  0x11   :  { %370 = vmatpush1.bf16.msra.mxu0 %v1830_v12  ;;  %452 = vmatpush1.bf16.msra.mxu1 %v1834_v14  ;;  %v1842_v22 = vcombine.low %v140_v18, %v144_v19  ;;  %v150_v24 = vld [vmem:[%s3030_s4 + $0xa0] sm:$0xff]  ;;  %v152_v27 = vld [vmem:[%s3030_s4 + $0xb0] sm:$0xff]  ;;  %v1841_v1 = vcombine.high %v139_v60, %v143_v61  ;;  %v147_v4 = vld [vmem:[%s3030_s4 + $0x88] sm:$0xff]  ;;  %v1840_v6 = vcombine.low %v139_v60, %v143_v61 }
  0x12   :  { %371 = vmatprep.subr.bf16.mxu0 %v1839_v17  ;;  %453 = vmatprep.subr.bf16.mxu1 %v1843_v21  ;;  %v1847_v25 = vcombine.high %v146_v23, %v150_v24  ;;  %v1846_v28 = vcombine.low %v146_v23, %v150_v24  ;;  %v1851_v29 = vcombine.high %v148_v26, %v152_v27  ;;  %v154_v31 = vld [vmem:[%s3030_s4 + $0xc0] sm:$0xff]  ;;  %v156_v34 = vld [vmem:[%s3030_s4 + $0xd0] sm:$0xff]  ;;  %v151_v5 = vld [vmem:[%s3030_s4 + $0xa8] sm:$0xff] }
  0x13   :  { %v1850_v30 = vcombine.low %v148_v26, %v152_v27  ;;  %v158_v32 = vld [vmem:[%s3030_s4 + $0xe0] sm:$0xff]  ;;  %v160_v35 = vld [vmem:[%s3030_s4 + $0xf0] sm:$0xff]  ;;  %v1849_v7 = vcombine.high %v147_v4, %v151_v5  ;;  %v155_v8 = vld [vmem:[%s3030_s4 + $0xc8] sm:$0xff]  ;;  %v1848_v10 = vcombine.low %v147_v4, %v151_v5 }
  0x14   :  { %v1855_v33 = vcombine.high %v154_v31, %v158_v32  ;;  %v1854_v36 = vcombine.low %v154_v31, %v158_v32  ;;  %v1859_v37 = vcombine.high %v156_v34, %v160_v35  ;;  %v1858_v38 = vcombine.low %v156_v34, %v160_v35  ;;  %v1826_v49 = vld [vmem:[%s3029_s3] ss:$0 sm:$0xff]  ;;  %v159_v9 = vld [vmem:[%s3030_s4 + $0xe8] sm:$0xff]  ;;  %v133_v12 = vld [vmem:[%s3030_s4 + $0x18] sm:$0xff] }
  0x15   :  { %372 = vmatpush1.bf16.msra.mxu0 %v1838_v20  ;;  %454 = vmatpush1.bf16.msra.mxu1 %v1842_v22  ;;  %v2130_v3 = vld [vmem:[%s3032_s6] sm:$0xff]   ;;  %v1857_v11 = vcombine.high %v155_v8, %v159_v9  ;;  %v137_v13 = vld [vmem:[%s3030_s4 + $0x38] sm:$0xff]  ;;  %v1856_v14 = vcombine.low %v155_v8, %v159_v9  ;;  %v2136_v8 = vld [vmem:[%s3034_s8 + $0x10] sm:$0xff]  }
  0x16   :  { %373 = vmatprep.subr.bf16.mxu0 %v1847_v25  ;;  %455 = vmatprep.subr.bf16.mxu1 %v1851_v29  ;;  %v1837_v15 = vcombine.high %v133_v12, %v137_v13  ;;  %v141_v16 = vld [vmem:[%s3030_s4 + $0x58] sm:$0xff]  ;;  %v1836_v18 = vcombine.low %v133_v12, %v137_v13  ;;  %v2131_v29 = vld [vmem:[%s3032_s6 + $0x8] sm:$0xff]   ;;  %v2134_v32 = vld [vmem:[%s3034_s8] sm:$0xff]  }
  0x17   :  { %v145_v17 = vld [vmem:[%s3030_s4 + $0x78] sm:$0xff]  ;;  %v2140_v12 = vld [vmem:[%s3034_s8 + $0x30] sm:$0xff]  }
  0x18   :  { %v1845_v19 = vcombine.high %v141_v16, %v145_v17  ;;  %v149_v20 = vld [vmem:[%s3030_s4 + $0x98] sm:$0xff]  ;;  %v1844_v22 = vcombine.low %v141_v16, %v145_v17 }
  0x19   :  { %374 = vmatpush1.bf16.msra.mxu0 %v1846_v28  ;;  %456 = vmatpush1.bf16.msra.mxu1 %v1850_v30  ;;  %v153_v21 = vld [vmem:[%s3030_s4 + $0xb8] sm:$0xff]  ;;  %v2132_v30 = vld [vmem:[%s3032_s6 + $0x10] sm:$0xff]  }
  0x1a   :  { %375 = vmatprep.subr.bf16.mxu0 %v1855_v33  ;;  %457 = vmatprep.subr.bf16.mxu1 %v1859_v37  ;;  %v1853_v23 = vcombine.high %v149_v20, %v153_v21  ;;  %v157_v24 = vld [vmem:[%s3030_s4 + $0xd8] sm:$0xff]  ;;  %v1852_v26 = vcombine.low %v149_v20, %v153_v21 }
  0x1b   :  { %v161_v25 = vld [vmem:[%s3030_s4 + $0xf8] sm:$0xff] }
  0x1c   :  { %v1861_v27 = vcombine.high %v157_v24, %v161_v25  ;;  %v1860_v28 = vcombine.low %v157_v24, %v161_v25  ;;  %v2133_v31 = vld [vmem:[%s3032_s6 + $0x18] sm:$0xff]  }
  0x1d   :  { %376 = vmatpush1.bf16.msra.mxu0 %v1854_v36  ;;  %458 = vmatpush1.bf16.msra.mxu1 %v1858_v38  ;;  %v165_v36 = vlaneseq  ;;  %v2566_v38 = vld [vmem:[%s3031_s5] sm:$0xff]  ;;  %v2137_v9 = vld [vmem:[%s3034_s8 + $0x18] sm:$0xff]  }
  0x1e   :  { %2042 = vmatprep.subr.bf16.mxu1 %v2312_v2  ;;  %410 = vmatprep.subr.bf16.mxu0 %v1833_v41  ;;  %v2141_v13 = vld [vmem:[%s3034_s8 + $0x38] sm:$0xff]  }
  0x1f   :  { %v2561_v37 = vshrl.u32 %v165_v36, 7 }
  0x21   :  { %v2569_v39 = vsub.s32 0, %v2561_v37 }
  0x23   :  { %v168_v41 = vrot.slane %v2566_v38, %v2569_v39 }
  0x91   :  { %v537_v44 = vpop.xlane.xlu0 %536 }
  0x92   :  { %v539_v45 = vmul.f32 0.015625, %v537_v44 }
  0x94   :  { %v2479_v46 = vsub.f32 %v2404_v0, %v539_v45 }
  0x96   :  { %v541_v47 = vmul.f32 %v2479_v46, %v2479_v46 }
  0x98   :  { %v542_v48 = vsel %vm534_vm0, %v541_v47, 0.0 }
  0x99   :  { %543 = vadd.xlane.f32.xlu0 %v542_v48 }
  0xde   :  { %v118_v50 = vpop.f32.mrb[0].mxu0 }
  0xdf   :  { %v119_v51 = vadd.f32 %v1826_v49, %v118_v50  ;;  %v2040_v52 = vpop.f32.mrb[1].mxu0 }
  0xe0   :  { %v121_v53 = vpop.f32.mrb[2].mxu0 }
  0xe1   :  { %v124_v54 = vsub.f32 0.0, %v119_v51  ;;  %v2041_v55 = vpop.f32.mrb[3].mxu0 }
  0xe3   :  { %v125_v56 = vmul.f32 1.442695, %v124_v54 }
  0xe5   :  { %2254 = vpow2.f32 %v125_v56 }
  0xef   :  { %v2255_v57 = vpop.eup %2254 }
  0xf0   :  { %v127_v58 = vadd.f32 1.0, %v2255_v57 }
  0xf2   :  { %2256 = vrcp.f32 %v127_v58 }
  0xfc   :  { %v2257_v59 = vpop.eup %2256 }
  0xfd   :  { %v129_v62 = vmul.f32 %v2257_v59, %v119_v51 }
  0xff   :  { %v163_v63 = vpack.c.bf16 %v129_v62, %v129_v62 }
 0x101   :  { %1862 = vmatmul.mubr.msk.bf16.vlgmr.msra.gmra.mrb[4].mxu0 %vm365_vm3, %v163_v63  ;;  %1864 = vmatmul.mubr.msk.bf16.vlgmr.msra.gmra.mrb[0].mxu1 %vm365_vm3, %v163_v63 }
 0x102   :  { %411 = vmatpush1.bf16.msra.mxu0 %v1832_v42  ;;  %442 = vmatprep.mubr.bf16.mxu0 %v2314_v43  ;;  %v2574_v42 = vsub.s32 1, %v2561_v37 }
 0x103   :  { %412 = vmatprep.subr.bf16.mxu0 %v1841_v1  ;;  %2043 = vmatpush3.bf16.msra.mxu1 %v2130_v3 }
 0x104   :  { %2044 = vmatprep.subr.bf16.mxu1 %v2312_v2  ;;  %2050 = vmatprep.mubr.msk.bf16.mxu1 %vm2313_vm1, %v2312_v2  ;;  %v172_v49 = vrot.slane %v2566_v38, %v2574_v42 }
 0x106   :  { %413 = vmatpush1.bf16.msra.mxu0 %v1840_v6 }
 0x107   :  { %414 = vmatprep.subr.bf16.mxu0 %v1849_v7  ;;  %2045 = vmatpush3.bf16.msra.mxu1 %v2131_v29  ;;  %v2135_v7 = vld [vmem:[%s3034_s8 + $0x8] sm:$0xff]  }
 0x108   :  { %2046 = vmatprep.subr.bf16.mxu1 %v2312_v2 }
 0x10a   :  { %415 = vmatpush1.bf16.msra.mxu0 %v1848_v10  ;;  %v2138_v10 = vld [vmem:[%s3034_s8 + $0x20] sm:$0xff]  }
 0x10b   :  { %416 = vmatprep.subr.bf16.mxu0 %v1857_v11  ;;  %2047 = vmatpush3.bf16.msra.mxu1 %v2132_v30  ;;  %v2139_v11 = vld [vmem:[%s3034_s8 + $0x28] sm:$0xff]   ;;  %v175_v30 = vsub.s32 2, %v2561_v37 }
 0x10c   :  { %2048 = vmatprep.subr.bf16.mxu1 %v2312_v2 }
 0x10e   :  { %417 = vmatpush1.bf16.msra.mxu0 %v1856_v14  ;;  %v1866_v14 = vld [vmem:[%s3033_s7] ss:$0 sm:$0xff] }
 0x10f   :  { %492 = vmatprep.subr.bf16.mxu0 %v1837_v15  ;;  %2049 = vmatpush3.bf16.msra.mxu1 %v2133_v31  ;;  %v176_v31 = vrot.slane %v2566_v38, %v175_v30 }
 0x110   :  { %2074 = vmatprep.subr.bf16.mxu1 %v2312_v2 }
 0x111   :  { %1863 = vmatmul.mubr.msk.bf16.vlgmr.msra.gmra.mrb[8].mxu0 %vm365_vm3, %v163_v63 }
 0x112   :  { %493 = vmatpush1.bf16.msra.mxu0 %v1836_v18  ;;  %524 = vmatprep.mubr.bf16.mxu0 %v2314_v43 }
 0x113   :  { %494 = vmatprep.subr.bf16.mxu0 %v1845_v19 }
 0x116   :  { %495 = vmatpush1.bf16.msra.mxu0 %v1844_v22 }
 0x117   :  { %496 = vmatprep.subr.bf16.mxu0 %v1853_v23 }
 0x11a   :  { %497 = vmatpush1.bf16.msra.mxu0 %v1852_v26 }
 0x11b   :  { %498 = vmatprep.subr.bf16.mxu0 %v1861_v27 }
 0x11e   :  { %499 = vmatpush1.bf16.msra.mxu0 %v1860_v28 }
 0x11f   :  { %2054 = vmatprep.subr.bf16.mxu0 %v2312_v2 }
 0x121   :  { %1865 = vmatmul.mubr.msk.bf16.vlgmr.msra.gmra.mrb[12].mxu0 %vm365_vm3, %v163_v63 }
 0x122   :  { %2070 = vmatprep.mubr.msk.bf16.mxu0 %vm2313_vm1, %v2312_v2  ;;  %2055 = vmatpush3.bf16.msra.mxu0 %v2134_v32  ;;  %v1872_v32 = vld [vmem:[%s3035_s9] ss:$0 sm:$0xff] }
 0x123   :  { %2056 = vmatprep.subr.bf16.mxu0 %v2312_v2 }
 0x126   :  { %v544_v33 = vpop.xlane.xlu0 %543  ;;  %2057 = vmatpush3.bf16.msra.mxu0 %v2135_v7 }
 0x127   :  { %v545_v34 = vmul.f32 0.015625, %v544_v33  ;;  %2058 = vmatprep.subr.bf16.mxu0 %v2312_v2 }
 0x129   :  { %v546_v35 = vadd.f32 1e-05, %v545_v34  ;;  %v767_v34 = vrot.slane %v2404_v0, %v2569_v39  ;;  %v2142_v0 = vld [vmem:[%s3032_s6 + $0x20] sm:$0xff]  }
 0x12a   :  { %2059 = vmatpush3.bf16.msra.mxu0 %v2136_v8 }
 0x12b   :  { %2258 = vrsqrt.f32 %v546_v35  ;;  %2060 = vmatprep.subr.bf16.mxu0 %v2312_v2 }
 0x12e   :  { %2061 = vmatpush3.bf16.msra.mxu0 %v2137_v9 }
 0x12f   :  { %2062 = vmatprep.subr.bf16.mxu0 %v2312_v2 }
 0x132   :  { %2063 = vmatpush3.bf16.msra.mxu0 %v2138_v10 }
 0x133   :  { %2064 = vmatprep.subr.bf16.mxu0 %v2312_v2 }
 0x135   :  { %v2259_v40 = vpop.eup %2258 }
 0x136   :  { %v548_v44 = vmul.f32 %v2259_v40, %v2479_v46  ;;  %2065 = vmatpush3.bf16.msra.mxu0 %v2139_v11 }
 0x137   :  { %2066 = vmatprep.subr.bf16.mxu0 %v2312_v2 }
 0x138   :  { %v554_v55 = vrot.slane %v548_v44, %v2569_v39 }
 0x13a   :  { %2067 = vmatpush3.bf16.msra.mxu0 %v2140_v12 }
 0x13b   :  { %2068 = vmatprep.subr.bf16.mxu0 %v2312_v2 }
 0x13e   :  { %2069 = vmatpush3.bf16.msra.mxu0 %v2141_v13 }
 0x1d4   :  { %v403_v45 = vpop.f32.mrb[4].mxu0  ;;  %v2577_v47 = vpop.f32.mrb[0].mxu1 }
 0x1d5   :  { %v404_v48 = vadd.f32 %v403_v45, %v168_v41  ;;  %v405_v50 = vpop.f32.mrb[5].mxu0  ;;  %v2581_v51 = vpop.f32.mrb[1].mxu1 }
 0x1d6   :  { %v407_v52 = vpop.f32.mrb[6].mxu0  ;;  %v489_v53 = vpop.f32.mrb[2].mxu1  ;;  %v406_v59 = vadd.f32 %v405_v50, %v172_v49 }
 0x1d7   :  { %v549_v54 = vadd.f32 1.0, %v404_v48  ;;  %v408_v56 = vpop.f32.mrb[7].mxu0  ;;  %v490_v57 = vpop.f32.mrb[3].mxu1 }
 0x1d8   :  { %v2143_v57 = vld [vmem:[%s3032_s6 + $0x28] sm:$0xff]  }
 0x1d9   :  { %v556_v58 = vmul.f32 %v554_v55, %v549_v54 }
 0x1db   :  { %v557_v46 = vadd.f32 %v556_v58, %v406_v59  ;;  %v2144_v58 = vld [vmem:[%s3032_s6 + $0x30] sm:$0xff]   ;;  %v2145_v59 = vld [vmem:[%s3032_s6 + $0x38] sm:$0xff]  }
 0x1dd   :  { %v567_v60 = vpack.c.bf16 %v557_v46, %v557_v46 }
 0x1df   :  { %2051 = vmatmul.mubr.msk.bf16.vlgmr.msra.gmra.mrb[4].mxu1 %vm365_vm3, %v567_v60 }
 0x1e0   :  { %2082 = vmatprep.mubr.msk.bf16.mxu1 %vm2313_vm1, %v2312_v2  ;;  %2075 = vmatpush3.bf16.msra.mxu1 %v2142_v0 }
 0x1e1   :  { %2076 = vmatprep.subr.bf16.mxu1 %v2312_v2 }
 0x1e4   :  { %v444_v61 = vpop.f32.mrb[8].mxu0  ;;  %2077 = vmatpush3.bf16.msra.mxu1 %v2143_v57 }
 0x1e5   :  { %v2587_v62 = vpop.f32.mrb[9].mxu0  ;;  %v445_v35 = vadd.f32 %v444_v61, %v176_v31  ;;  %2078 = vmatprep.subr.bf16.mxu1 %v2312_v2 }
 0x1e6   :  { %v448_v63 = vpop.f32.mrb[10].mxu0 }
 0x1e7   :  { %v449_v1 = vpop.f32.mrb[11].mxu0  ;;  %v179_v63 = vsub.s32 3, %v2561_v37 }
 0x1e8   :  { %2079 = vmatpush3.bf16.msra.mxu1 %v2144_v58 }
 0x1e9   :  { %2080 = vmatprep.subr.bf16.mxu1 %v2312_v2  ;;  %v180_v1 = vrot.slane %v2566_v38, %v179_v63 }
 0x1ec   :  { %2081 = vmatpush3.bf16.msra.mxu1 %v2145_v59 }
 0x1ed   :  { %2086 = vmatprep.subr.bf16.mxu1 %v2312_v2 }
 0x1f4   :  { %v2589_v3 = vpop.f32.mrb[12].mxu0 }
 0x1f5   :  { %v2591_v4 = vpop.f32.mrb[13].mxu0 }
 0x1f6   :  { %v530_v5 = vpop.f32.mrb[14].mxu0 }
 0x1f7   :  { %v531_v6 = vpop.f32.mrb[15].mxu0  ;;  %v183_v5 = vsub.s32 4, %v2561_v37 }
 0x1f8   :  { %v447_v6 = vadd.f32 %v2587_v62, %v180_v1  ;;  %v2147_v62 = vld [vmem:[%s3034_s8 + $0x48] sm:$0xff]  }
 0x1f9   :  { %v184_v7 = vrot.slane %v2566_v38, %v183_v5  ;;  %v2159_v1 = vld [vmem:[%s3036_s10 + $0x1c] ss:$12 sps:$4 sm:$0xff]   ;;  %v2157_v5 = vld [vmem:[%s3036_s10 + $0x18] ss:$12 sps:$4 sm:$0xff]  }
 0x1fa   :  { %v783_v9 = vadd.f32 1.0, %v447_v6  ;;  %v2162_v6 = vld [vmem:[%s3036_s10 + $0x34] ss:$12 sps:$4 sm:$0xff]  }
 0x1fb   :  { %v486_v11 = vadd.f32 %v2577_v47, %v184_v7  ;;  %v2148_v47 = vld [vmem:[%s3034_s8 + $0x50] sm:$0xff]  }
 0x1fc   :  { %v2160_v7 = vld [vmem:[%s3036_s10 + $0x30] ss:$12 sps:$4 sm:$0xff]  }
 0x2b2   :  { %v635_v15 = vpop.f32.mrb[4].mxu1 }
 0x2b3   :  { %v636_v16 = vadd.f32 %v1866_v14, %v635_v15  ;;  %v2052_v17 = vpop.f32.mrb[5].mxu1  ;;  %v2146_v14 = vld [vmem:[%s3034_s8 + $0x40] sm:$0xff]  }
 0x2b4   :  { %v638_v18 = vpop.f32.mrb[6].mxu1  ;;  %v2150_v17 = vld [vmem:[%s3034_s8 + $0x60] sm:$0xff]  }
 0x2b5   :  { %v642_v19 = vmul.f32 %v636_v16, %v636_v16  ;;  %v2053_v20 = vpop.f32.mrb[7].mxu1  ;;  %v641_v26 = vmul.f32 0.5, %v636_v16  ;;  %v2151_v18 = vld [vmem:[%s3034_s8 + $0x68] sm:$0xff]  }
 0x2b6   :  { %v2153_v20 = vld [vmem:[%s3034_s8 + $0x78] sm:$0xff]  }
 0x2b7   :  { %v643_v21 = vmul.f32 %v642_v19, %v636_v16  ;;  %v2152_v19 = vld [vmem:[%s3034_s8 + $0x70] sm:$0xff]  }
 0x2b9   :  { %v644_v22 = vmul.f32 0.044715, %v643_v21  ;;  %v1890_v21 = vld [vmem:[%s3033_s7 + $0x1] ss:$0 sm:$0xff] }
 0x2bb   :  { %v645_v23 = vadd.f32 %v644_v22, %v636_v16  ;;  %v2149_v16 = vld [vmem:[%s3034_s8 + $0x58] sm:$0xff]  }
 0x2bd   :  { %v646_v24 = vmul.f32 0.7978846, %v645_v23 }
 0x2bf   :  { %2260 = vtanh.f32 %v646_v24 }
 0x2c9   :  { %v2261_v25 = vpop.eup %2260 }
 0x2ca   :  { %v648_v27 = vadd.f32 1.0, %v2261_v25 }
 0x2cc   :  { %v649_v28 = vmul.f32 %v648_v27, %v641_v26 }
 0x2ce   :  { %v667_v29 = vpack.c.bf16 %v649_v28, %v649_v28 }
 0x2d0   :  { %2071 = vmatmul.mubr.bf16.vlgmr.msra.gmra.mrb[16].mxu0 %v667_v29 }
 0x2d1   :  { %1145 = vmatprep.mubr.bf16.mxu0 %v2314_v43 }
 0x3a3   :  { %v756_v33 = vpop.f32.mrb[16].mxu0 }
 0x3a4   :  { %v757_v40 = vadd.f32 %v1872_v32, %v756_v33  ;;  %v2072_v41 = vpop.f32.mrb[17].mxu0 }
 0x3a5   :  { %v759_v44 = vpop.f32.mrb[18].mxu0 }
 0x3a6   :  { %v762_v45 = vmul.f32 %v757_v40, %v445_v35  ;;  %v2073_v48 = vpop.f32.mrb[19].mxu0  ;;  %v187_v44 = vsub.s32 5, %v2561_v37 }
 0x3a7   :  { %v1913_v48 = vld [vmem:[%s3035_s9 + $0x1] ss:$0 sm:$0xff] }
 0x3a8   :  { %v2633_v49 = vadd.f32 %v767_v34, %v762_v45  ;;  %v188_v45 = vrot.slane %v2566_v38, %v187_v44 }
 0x3aa   :  { %v770_v50 = vsel %vm365_vm3, %v2633_v49, 0.0 }
 0x3ab   :  { %771 = vadd.xlane.f32.xlu1 %v770_v50 }
 0x438   :  { %v772_v52 = vpop.xlane.xlu1 %771 }
 0x439   :  { %v773_v53 = vmul.f32 0.015625, %v772_v52  ;;  %v488_v52 = vadd.f32 %v2581_v51, %v188_v45  ;;  %v2156_v51 = vld [vmem:[%s3036_s10 + $0x4] ss:$12 sps:$4 sm:$0xff]  }
 0x43a   :  { %1113 = vmatprep.subr.bf16.mxu0 %v2156_v51  ;;  %v2215_v51 = vld [vmem:[%s3038_s12 + $0xf0] ss:$8 sps:$4 sm:$0xff]  }
 0x43b   :  { %v774_v54 = vsub.f32 %v2633_v49, %v773_v53 }
 0x43d   :  { %v775_v55 = vmul.f32 %v774_v54, %v774_v54 }
 0x43f   :  { %v776_v56 = vsel %vm365_vm3, %v775_v55, 0.0 }
 0x440   :  { %777 = vadd.xlane.f32.xlu1 %v776_v56 }
 0x4cd   :  { %v778_v46 = vpop.xlane.xlu1 %777 }
 0x4ce   :  { %v779_v60 = vmul.f32 0.015625, %v778_v46 }
 0x4d0   :  { %v780_v61 = vadd.f32 1e-05, %v779_v60 }
 0x4d2   :  { %2262 = vrsqrt.f32 %v780_v61 }
 0x4dc   :  { %v2263_v8 = vpop.eup %2262 }
 0x4dd   :  { %v782_v10 = vmul.f32 %v2263_v8, %v774_v54  ;;  %v2165_v8 = vld [vmem:[%s3036_s10 + $0x4c] ss:$12 sps:$4 sm:$0xff]  }
 0x4df   :  { %v784_v12 = vmul.f32 %v783_v9, %v782_v10  ;;  %v2163_v9 = vld [vmem:[%s3036_s10 + $0x48] ss:$12 sps:$4 sm:$0xff]  }
 0x4e0   :  { %v2170_v10 = vld [vmem:[%s3038_s12] ss:$8 sps:$4 sm:$0xff]  }
 0x4e1   :  { %v785_v13 = vadd.f32 %v784_v12, %v486_v11  ;;  %v2172_v11 = vld [vmem:[%s3038_s12 + $0x4] ss:$8 sps:$4 sm:$0xff]   ;;  %v2175_v12 = vld [vmem:[%s3038_s12 + $0x14] ss:$8 sps:$4 sm:$0xff]  }
 0x4e3   :  { %v797_v15 = vpack.c.bf16 %v785_v13, %v785_v13  ;;  %v2173_v13 = vld [vmem:[%s3038_s12 + $0x10] ss:$8 sps:$4 sm:$0xff]  }
 0x4e5   :  { %2083 = vmatmul.mubr.msk.bf16.vlgmr.msra.gmra.mrb[8].mxu1 %vm365_vm3, %v797_v15  ;;  %v2176_v15 = vld [vmem:[%s3038_s12 + $0x20] ss:$8 sps:$4 sm:$0xff]  }
 0x4e6   :  { %2087 = vmatpush3.bf16.msra.mxu1 %v2146_v14  ;;  %2102 = vmatprep.mubr.msk.bf16.mxu1 %vm2313_vm1, %v2312_v2  ;;  %v2178_v14 = vld [vmem:[%s3038_s12 + $0x24] ss:$8 sps:$4 sm:$0xff]  }
 0x4e7   :  { %2088 = vmatprep.subr.bf16.mxu1 %v2312_v2 }
 0x4ea   :  { %2089 = vmatpush3.bf16.msra.mxu1 %v2147_v62  ;;  %v2181_v62 = vld [vmem:[%s3038_s12 + $0x34] ss:$8 sps:$4 sm:$0xff]  }
 0x4eb   :  { %2090 = vmatprep.subr.bf16.mxu1 %v2312_v2 }
 0x4ee   :  { %2091 = vmatpush3.bf16.msra.mxu1 %v2148_v47  ;;  %v2179_v47 = vld [vmem:[%s3038_s12 + $0x30] ss:$8 sps:$4 sm:$0xff]  }
 0x4ef   :  { %2092 = vmatprep.subr.bf16.mxu1 %v2312_v2 }
 0x4f2   :  { %2093 = vmatpush3.bf16.msra.mxu1 %v2149_v16  ;;  %v2184_v16 = vld [vmem:[%s3038_s12 + $0x44] ss:$8 sps:$4 sm:$0xff]  }
 0x4f3   :  { %2094 = vmatprep.subr.bf16.mxu1 %v2312_v2 }
 0x4f6   :  { %2095 = vmatpush3.bf16.msra.mxu1 %v2150_v17  ;;  %v2182_v17 = vld [vmem:[%s3038_s12 + $0x40] ss:$8 sps:$4 sm:$0xff]  }
 0x4f7   :  { %2096 = vmatprep.subr.bf16.mxu1 %v2312_v2 }
 0x4fa   :  { %2097 = vmatpush3.bf16.msra.mxu1 %v2151_v18  ;;  %v2187_v18 = vld [vmem:[%s3038_s12 + $0x54] ss:$8 sps:$4 sm:$0xff]  }
 0x4fb   :  { %2098 = vmatprep.subr.bf16.mxu1 %v2312_v2 }
 0x4fe   :  { %2099 = vmatpush3.bf16.msra.mxu1 %v2152_v19  ;;  %v2185_v19 = vld [vmem:[%s3038_s12 + $0x50] ss:$8 sps:$4 sm:$0xff]  }
 0x4ff   :  { %2100 = vmatprep.subr.bf16.mxu1 %v2312_v2 }
 0x502   :  { %2101 = vmatpush3.bf16.msra.mxu1 %v2153_v20  ;;  %v2190_v20 = vld [vmem:[%s3038_s12 + $0x64] ss:$8 sps:$4 sm:$0xff]  }
 0x503   :  { %1524 = vmatprep.subr.bf16.mxu1 %v2172_v11  ;;  %v2249_v11 = vld [vmem:[%s3040_s14 + $0x38] sm:$0xff]  }
 0x5b8   :  { %v865_v22 = vpop.f32.mrb[8].mxu1 }
 0x5b9   :  { %v866_v23 = vadd.f32 %v1890_v21, %v865_v22  ;;  %v2084_v24 = vpop.f32.mrb[9].mxu1  ;;  %v2188_v21 = vld [vmem:[%s3038_s12 + $0x60] ss:$8 sps:$4 sm:$0xff]   ;;  %v2193_v22 = vld [vmem:[%s3038_s12 + $0x74] ss:$8 sps:$4 sm:$0xff]  }
 0x5ba   :  { %v868_v25 = vpop.f32.mrb[10].mxu1  ;;  %v2196_v24 = vld [vmem:[%s3038_s12 + $0x84] ss:$8 sps:$4 sm:$0xff]  }
 0x5bb   :  { %v872_v26 = vmul.f32 %v866_v23, %v866_v23  ;;  %v2085_v27 = vpop.f32.mrb[11].mxu1  ;;  %v871_v34 = vmul.f32 0.5, %v866_v23  ;;  %v2194_v25 = vld [vmem:[%s3038_s12 + $0x80] ss:$8 sps:$4 sm:$0xff]  }
 0x5bd   :  { %v873_v28 = vmul.f32 %v872_v26, %v866_v23 }
 0x5bf   :  { %v874_v29 = vmul.f32 0.044715, %v873_v28 }
 0x5c1   :  { %v875_v31 = vadd.f32 %v874_v29, %v866_v23  ;;  %v2191_v23 = vld [vmem:[%s3038_s12 + $0x70] ss:$8 sps:$4 sm:$0xff]   ;;  %v191_v29 = vsub.s32 6, %v2561_v37 }
 0x5c3   :  { %v876_v32 = vmul.f32 0.7978846, %v875_v31  ;;  %v192_v31 = vrot.slane %v2566_v38, %v191_v29 }
 0x5c5   :  { %2264 = vtanh.f32 %v876_v32  ;;  %v195_v32 = vsub.s32 7, %v2561_v37  ;;  %v2218_v37 = vld [vmem:[%s3038_s12 + $0x100] ss:$8 sps:$4 sm:$0xff]  }
 0x5cf   :  { %v2265_v33 = vpop.eup %2264 }
 0x5d0   :  { %v878_v35 = vadd.f32 1.0, %v2265_v33  ;;  %v527_v33 = vadd.f32 %v2589_v3, %v192_v31  ;;  %v2168_v3 = vld [vmem:[%s3036_s10 + $0x38] ss:$12 sps:$4 sm:$0xff]  }
 0x5d2   :  { %v879_v40 = vmul.f32 %v878_v35, %v871_v34  ;;  %v196_v34 = vrot.slane %v2566_v38, %v195_v32  ;;  %v2167_v38 = vld [vmem:[%s3036_s10 + $0x20] ss:$12 sps:$4 sm:$0xff]  }
 0x5d4   :  { %v899_v41 = vpack.c.bf16 %v879_v40, %v879_v40  ;;  %v996_v40 = vadd.f32 1.0, %v527_v33  ;;  %v529_v44 = vadd.f32 %v2591_v4, %v196_v34  ;;  %v2169_v4 = vld [vmem:[%s3036_s10 + $0x50] ss:$12 sps:$4 sm:$0xff]  }
 0x5d6   :  { %2103 = vmatmul.mubr.bf16.vlgmr.msra.gmra.mrb[12].mxu1 %v899_v41 }
 0x5d7   :  { %1525 = vmatpush1.bf16.msra.mxu1 %v2170_v10  ;;  %v2248_v10 = vld [vmem:[%s3040_s14 + $0x30] sm:$0xff]  }
 0x5d8   :  { %1526 = vmatprep.subr.bf16.mxu1 %v2175_v12  ;;  %v2250_v12 = vld [vmem:[%s3040_s14 + $0x40] sm:$0xff]  }
 0x5db   :  { %1527 = vmatpush1.bf16.msra.mxu1 %v2173_v13  ;;  %v2251_v13 = vld [vmem:[%s3040_s14 + $0x48] sm:$0xff]  }
 0x5dc   :  { %1528 = vmatprep.subr.bf16.mxu1 %v2178_v14  ;;  %v1028_v14 = vld [vmem:[%s3037_s11] sm:$0x7] }
 0x5dd   :  { %v1042_v32 = vrot.slane %v1028_v14, %v175_v30 }
 0x5df   :  { %1529 = vmatpush1.bf16.msra.mxu1 %v2176_v15  ;;  %v1034_v15 = vrot.slane %v1028_v14, %v2569_v39 }
 0x5e0   :  { %1530 = vmatprep.subr.bf16.mxu1 %v2181_v62  ;;  %v1038_v62 = vrot.slane %v1028_v14, %v2574_v42  ;;  %v2252_v14 = vld [vmem:[%s3040_s14 + $0x50] sm:$0xff]  }
 0x5e3   :  { %1531 = vmatpush1.bf16.msra.mxu1 %v2179_v47 }
 0x5e4   :  { %1532 = vmatprep.subr.bf16.mxu1 %v2184_v16 }
 0x5e7   :  { %1533 = vmatpush1.bf16.msra.mxu1 %v2182_v17 }
 0x5e8   :  { %1534 = vmatprep.subr.bf16.mxu1 %v2187_v18 }
 0x5eb   :  { %1535 = vmatpush1.bf16.msra.mxu1 %v2185_v19 }
 0x5ec   :  { %1536 = vmatprep.subr.bf16.mxu1 %v2190_v20 }
 0x5ef   :  { %1537 = vmatpush1.bf16.msra.mxu1 %v2188_v21 }
 0x5f0   :  { %1538 = vmatprep.subr.bf16.mxu1 %v2193_v22 }
 0x5f3   :  { %1539 = vmatpush1.bf16.msra.mxu1 %v2191_v23 }
 0x5f4   :  { %1540 = vmatprep.subr.bf16.mxu1 %v2196_v24 }
 0x5f7   :  { %1541 = vmatpush1.bf16.msra.mxu1 %v2194_v25 }
 0x6a9   :  { %v988_v50 = vpop.f32.mrb[12].mxu1 }
 0x6aa   :  { %v989_v53 = vadd.f32 %v1913_v48, %v988_v50  ;;  %v2104_v54 = vpop.f32.mrb[13].mxu1  ;;  %v2166_v50 = vld [vmem:[%s3036_s10 + $0x8] ss:$12 sps:$4 sm:$0xff]  }
 0x6ab   :  { %v991_v55 = vpop.f32.mrb[14].mxu1  ;;  %v2197_v54 = vld [vmem:[%s3038_s12 + $0x90] ss:$8 sps:$4 sm:$0xff]  }
 0x6ac   :  { %v994_v56 = vmul.f32 %v989_v53, %v488_v52  ;;  %v2105_v0 = vpop.f32.mrb[15].mxu1  ;;  %v2199_v53 = vld [vmem:[%s3038_s12 + $0x94] ss:$8 sps:$4 sm:$0xff]   ;;  %v2202_v55 = vld [vmem:[%s3038_s12 + $0xa4] ss:$8 sps:$4 sm:$0xff]  }
 0x6ad   :  { %1542 = vmatprep.subr.bf16.mxu1 %v2199_v53  ;;  %v2203_v0 = vld [vmem:[%s3038_s12 + $0xb0] ss:$8 sps:$4 sm:$0xff]  }
 0x6ae   :  { %v995_v57 = vadd.f32 %v994_v56, %v2633_v49  ;;  %v2154_v49 = vld [vmem:[%s3036_s10] ss:$12 sps:$4 sm:$0xff]   ;;  %1543 = vmatpush1.bf16.msra.mxu1 %v2197_v54  ;;  %v2205_v56 = vld [vmem:[%s3038_s12 + $0xb4] ss:$8 sps:$4 sm:$0xff]  }
 0x6af   :  { %1114 = vmatpush1.bf16.msra.mxu0 %v2154_v49  ;;  %1544 = vmatprep.subr.bf16.mxu1 %v2202_v55  ;;  %v2220_v49 = vld [vmem:[%s3038_s12 + $0x104] ss:$8 sps:$4 sm:$0xff]  }
 0x6b0   :  { %v997_v58 = vsel %vm365_vm3, %v995_v57, 0.0  ;;  %1115 = vmatprep.subr.bf16.mxu0 %v2159_v1  ;;  %v2242_v1 = vld [vmem:[%s3040_s14] sm:$0xff]  }
 0x6b1   :  { %998 = vadd.xlane.f32.xlu0 %v997_v58  ;;  %v2206_v58 = vld [vmem:[%s3038_s12 + $0xc0] ss:$8 sps:$4 sm:$0xff]  }
 0x6b3   :  { %1116 = vmatpush1.bf16.msra.mxu0 %v2157_v5  ;;  %v2243_v5 = vld [vmem:[%s3040_s14 + $0x8] sm:$0xff]  }
 0x6b4   :  { %1117 = vmatprep.subr.bf16.mxu0 %v2162_v6  ;;  %v2244_v6 = vld [vmem:[%s3040_s14 + $0x10] sm:$0xff]  }
 0x6b7   :  { %1118 = vmatpush1.bf16.msra.mxu0 %v2160_v7  ;;  %v2245_v7 = vld [vmem:[%s3040_s14 + $0x18] sm:$0xff]  }
 0x6b8   :  { %1119 = vmatprep.subr.bf16.mxu0 %v2165_v8  ;;  %v2246_v8 = vld [vmem:[%s3040_s14 + $0x20] sm:$0xff]  }
 0x6bb   :  { %1120 = vmatpush1.bf16.msra.mxu0 %v2163_v9  ;;  %v2247_v9 = vld [vmem:[%s3040_s14 + $0x28] sm:$0xff]  }
 0x6bc   :  { %2106 = vmatprep.subr.bf16.mxu0 %v2312_v2 }
 0x73e   :  { %v999_v59 = vpop.xlane.xlu0 %998 }
 0x73f   :  { %v1000_v46 = vmul.f32 0.015625, %v999_v59  ;;  %v2211_v59 = vld [vmem:[%s3038_s12 + $0xd4] ss:$8 sps:$4 sm:$0xff]  }
 0x741   :  { %v2706_v60 = vsub.f32 %v995_v57, %v1000_v46  ;;  %v2208_v57 = vld [vmem:[%s3038_s12 + $0xc4] ss:$8 sps:$4 sm:$0xff]   ;;  %v2209_v46 = vld [vmem:[%s3038_s12 + $0xd0] ss:$8 sps:$4 sm:$0xff]  }
 0x743   :  { %v1002_v61 = vmul.f32 %v2706_v60, %v2706_v60 }
 0x745   :  { %v1003_v63 = vsel %vm365_vm3, %v1002_v61, 0.0  ;;  %v2212_v61 = vld [vmem:[%s3038_s12 + $0xe0] ss:$8 sps:$4 sm:$0xff]  }
 0x746   :  { %1004 = vadd.xlane.f32.xlu1 %v1003_v63  ;;  %v2217_v63 = vld [vmem:[%s3038_s12 + $0xf4] ss:$8 sps:$4 sm:$0xff]  }
 0x7d3   :  { %v1005_v26 = vpop.xlane.xlu1 %1004 }
 0x7d4   :  { %v1006_v27 = vmul.f32 0.015625, %v1005_v26 }
 0x7d6   :  { %v1007_v28 = vadd.f32 1e-05, %v1006_v27 }
 0x7d8   :  { %2266 = vrsqrt.f32 %v1007_v28 }
 0x7e2   :  { %v2267_v35 = vpop.eup %2266 }
 0x7e3   :  { %v1009_v41 = vmul.f32 %v2267_v35, %v2706_v60  ;;  %v2214_v60 = vld [vmem:[%s3038_s12 + $0xe4] ss:$8 sps:$4 sm:$0xff]  }
 0x7e5   :  { %v1010_v45 = vmul.f32 %v1009_v41, %v996_v40 }
 0x7e7   :  { %v1011_v48 = vadd.f32 %v1010_v45, %v529_v44 }
 0x7e9   :  { %v1029_v52 = vpack.c.bf16 %v1011_v48, %v1011_v48 }
 0x7eb   :  { %1934 = vmatmul.mubr.msk.bf16.vlgmr.msra.gmra.mrb[20].mxu0 %vm365_vm3, %v1029_v52 }
 0x7ec   :  { %2107 = vmatpush3.bf16.msra.mxu0 %v2166_v50  ;;  %2114 = vmatprep.mubr.msk.bf16.mxu0 %vm2313_vm1, %v2312_v2 }
 0x7ed   :  { %2108 = vmatprep.subr.bf16.mxu0 %v2312_v2 }
 0x7f0   :  { %2109 = vmatpush3.bf16.msra.mxu0 %v2167_v38 }
 0x7f1   :  { %2110 = vmatprep.subr.bf16.mxu0 %v2312_v2 }
 0x7f4   :  { %2111 = vmatpush3.bf16.msra.mxu0 %v2168_v3 }
 0x7f5   :  { %2112 = vmatprep.subr.bf16.mxu0 %v2312_v2  ;;  %v2200_v2 = vld [vmem:[%s3038_s12 + $0xa0] ss:$8 sps:$4 sm:$0xff]  }
 0x7f6   :  { %1545 = vmatpush1.bf16.msra.mxu1 %v2200_v2 }
 0x7f7   :  { %1546 = vmatprep.subr.bf16.mxu1 %v2205_v56  ;;  %v2223_v56 = vld [vmem:[%s3038_s12 + $0x114] ss:$8 sps:$4 sm:$0xff]  }
 0x7f8   :  { %2113 = vmatpush3.bf16.msra.mxu0 %v2169_v4 }
 0x7f9   :  { %1714 = vmatprep.subr.bf16.mxu0 %v2314_v43 }
 0x7fa   :  { %1547 = vmatpush1.bf16.msra.mxu1 %v2203_v0 }
 0x7fb   :  { %2115 = vmatmul.mubr.msk.bf16.vlgmr.msra.gmra.mrb[24].mxu0 %vm365_vm3, %v1029_v52  ;;  %1548 = vmatprep.subr.bf16.mxu1 %v2208_v57  ;;  %v2221_v57 = vld [vmem:[%s3038_s12 + $0x110] ss:$8 sps:$4 sm:$0xff]  }
 0x7fc   :  { %1715 = vmatpush1.bf16.msra.mxu0 %v2242_v1  ;;  %v2233_v1 = vld [vmem:[%s3038_s12 + $0x150] ss:$8 sps:$4 sm:$0xff]  }
 0x7fd   :  { %1716 = vmatprep.subr.bf16.mxu0 %v2314_v43 }
 0x7fe   :  { %1549 = vmatpush1.bf16.msra.mxu1 %v2206_v58  ;;  %v2226_v58 = vld [vmem:[%s3038_s12 + $0x124] ss:$8 sps:$4 sm:$0xff]  }
 0x7ff   :  { %1550 = vmatprep.subr.bf16.mxu1 %v2211_v59 }
 0x800   :  { %1717 = vmatpush1.bf16.msra.mxu0 %v2243_v5  ;;  %v2238_v5 = vld [vmem:[%s3038_s12 + $0x164] ss:$8 sps:$4 sm:$0xff]  }
 0x801   :  { %1718 = vmatprep.subr.bf16.mxu0 %v2314_v43 }
 0x802   :  { %1551 = vmatpush1.bf16.msra.mxu1 %v2209_v46  ;;  %v2224_v46 = vld [vmem:[%s3038_s12 + $0x120] ss:$8 sps:$4 sm:$0xff]  }
 0x803   :  { %1552 = vmatprep.subr.bf16.mxu1 %v2214_v60  ;;  %v2229_v60 = vld [vmem:[%s3038_s12 + $0x134] ss:$8 sps:$4 sm:$0xff]  }
 0x804   :  { %1719 = vmatpush1.bf16.msra.mxu0 %v2244_v6 }
 0x805   :  { %1720 = vmatprep.subr.bf16.mxu0 %v2314_v43 }
 0x806   :  { %1553 = vmatpush1.bf16.msra.mxu1 %v2212_v61  ;;  %v2227_v61 = vld [vmem:[%s3038_s12 + $0x130] ss:$8 sps:$4 sm:$0xff]  }
 0x807   :  { %1554 = vmatprep.subr.bf16.mxu1 %v2217_v63  ;;  %v2232_v63 = vld [vmem:[%s3038_s12 + $0x144] ss:$8 sps:$4 sm:$0xff]  }
 0x808   :  { %1721 = vmatpush1.bf16.msra.mxu0 %v2245_v7  ;;  %v2236_v7 = vld [vmem:[%s3038_s12 + $0x160] ss:$8 sps:$4 sm:$0xff]  }
 0x809   :  { %1722 = vmatprep.subr.bf16.mxu0 %v2314_v43 }
 0x80a   :  { %1555 = vmatpush1.bf16.msra.mxu1 %v2215_v51  ;;  %v2230_v51 = vld [vmem:[%s3038_s12 + $0x140] ss:$8 sps:$4 sm:$0xff]  }
 0x80b   :  { %1565 = vmatprep.subr.bf16.mxu1 %v2220_v49  ;;  %v2235_v49 = vld [vmem:[%s3038_s12 + $0x154] ss:$8 sps:$4 sm:$0xff]  }
 0x80c   :  { %1723 = vmatpush1.bf16.msra.mxu0 %v2246_v8  ;;  %v2241_v8 = vld [vmem:[%s3038_s12 + $0x174] ss:$8 sps:$4 sm:$0xff]  }
 0x80d   :  { %1724 = vmatprep.subr.bf16.mxu0 %v2314_v43 }
 0x810   :  { %1725 = vmatpush1.bf16.msra.mxu0 %v2247_v9 }
 0x811   :  { %1726 = vmatprep.subr.bf16.mxu0 %v2314_v43 }
 0x814   :  { %1727 = vmatpush1.bf16.msra.mxu0 %v2248_v10 }
 0x815   :  { %1728 = vmatprep.subr.bf16.mxu0 %v2314_v43 }
 0x818   :  { %1729 = vmatpush1.bf16.msra.mxu0 %v2249_v11  ;;  %v2239_v11 = vld [vmem:[%s3038_s12 + $0x170] ss:$8 sps:$4 sm:$0xff]  }
 0x819   :  { %1730 = vmatprep.subr.bf16.mxu0 %v2314_v43 }
 0x81c   :  { %1731 = vmatpush1.bf16.msra.mxu0 %v2250_v12 }
 0x81d   :  { %1732 = vmatprep.subr.bf16.mxu0 %v2314_v43 }
 0x820   :  { %1733 = vmatpush1.bf16.msra.mxu0 %v2251_v13 }
 0x821   :  { %1734 = vmatprep.subr.bf16.mxu0 %v2314_v43 }
 0x824   :  { %1735 = vmatpush1.bf16.msra.mxu0 %v2252_v14 }
 0x825   :  { %1736 = vmatprep.subr.bf16.mxu0 %v2314_v43 }
 0x8be   :  { %v1147_v47 = vpop.f32.mrb[20].mxu0 }
 0x8bf   :  { %v1148_v16 = vadd.f32 %v1147_v47, %v1034_v15  ;;  %v1149_v17 = vpop.f32.mrb[21].mxu0  ;;  %v2253_v15 = vld [vmem:[%s3040_s14 + $0x58] sm:$0xff]   ;;  %s2315_s14 = smov [#allocation2]  }
 0x8c0   :  { %v1150_v18 = vadd.f32 %v1149_v17, %v1038_v62  ;;  %v1151_v19 = vpop.f32.mrb[22].mxu0  ;;  %1737 = vmatpush1.bf16.msra.mxu0 %v2253_v15  ;;  %v1269_v62 = vld [vmem:[%s3039_s13] sm:$0x3] }
 0x8c1   :  { %v1197_v20 = vmul.f32 %v1148_v16, %v1148_v16  ;;  %v1152_v21 = vpop.f32.mrb[23].mxu0  ;;  %v1194_v50 = vmul.f32 0.5, %v1148_v16  ;;  %v1277_v47 = vrot.slane %v1269_v62, %v2569_v39  ;;  %v1984_v39 = vld [vmem:[%s3041_s15] ss:$0 sm:$0xff]  ;;  %s1818_s15 = sshll.u32 %s2315_s14, 4  ;;  %s1819_s15 = int_to_ptr.vmem [resolvable:$true] %s1818_s15 }
 0x8c2   :  { %v1198_v22 = vmul.f32 %v1150_v18, %v1150_v18  ;;  %v1195_v3 = vmul.f32 0.5, %v1150_v18  ;;  %s2288_s7 = scalar_lea.vmem %s1819_s15, 128  ;;  %p2293_p1 = scmp.lt.s32.totalorder %s1819_s15, %s1819_s15 }
 0x8c3   :  { %v1200_v23 = vmul.f32 %v1197_v20, %v1148_v16  ;;  %p2289_p0 = scmp.ne.s32.totalorder %s1819_s15, %s2288_s7  ;;  %p2294_p2 = scmp.lt.s32.totalorder %s2288_s7, %s2288_s7 }
 0x8c4   :  { %v1201_v24 = vmul.f32 %v1198_v22, %v1150_v18 }
 0x8c5   :  { %v1203_v25 = vmul.f32 0.044715, %v1200_v23  ;;  %p2295_p3 = por %p2294_p2, %p2293_p1 }
 0x8c6   :  { %v1204_v26 = vmul.f32 0.044715, %v1201_v24  ;;  %v2969_v24 = vand.u32 127, %v165_v36 }
 0x8c7   :  { %v1206_v27 = vadd.f32 %v1203_v25, %v1148_v16  ;;  %v1281_v16 = vrot.slane %v1269_v62, %v2574_v42  ;;  %p2296_p4 = pnand %p2295_p3, %p2289_p0 }
 0x8c8   :  { %v1207_v28 = vadd.f32 %v1204_v26, %v1150_v18  ;;  %vm1794_vm4 = vcmp.ge.s32.totalorder %v2969_v24, 12  ;;  %vm1795_vm5 = vcmp.lt.s32.totalorder %v2969_v24, 15  ;;  %vm1766_vm7 = vcmp.ge.s32.totalorder %v2969_v24, 3 }
 0x8c9   :  { %v1209_v29 = vmul.f32 0.7978846, %v1206_v27  ;;  %vm2976_vm6 = vmand %vm1794_vm4, %vm1795_vm5  ;;  %vm1767_vm8 = vcmp.lt.s32.totalorder %v2969_v24, 6  ;;  %vm1758_vm9 = vcmp.lt.s32.totalorder %v2969_v24, 3  ;;  %vm1775_vm10 = vcmp.ge.s32.totalorder %v2969_v24, 6 }
 0x8ca   :  { %v1210_v31 = vmul.f32 0.7978846, %v1207_v28  ;;  %vm1776_vm11 = vcmp.lt.s32.totalorder %v2969_v24, 9  ;;  %vm2987_vm12 = vmand %vm1766_vm7, %vm1767_vm8  ;;  %vm1807_vm14 = vcmp.lt.s32.totalorder %v2969_v24, 12 }
 0x8cb   :  { %2268 = vtanh.f32 %v1209_v29  ;;  %vm2995_vm13 = vmand %vm1775_vm10, %vm1776_vm11 }
 0x8cc   :  { %2270 = vtanh.f32 %v1210_v31 }
 0x8ce   :  { %v1188_v33 = vpop.f32.mrb[24].mxu0 }
 0x8cf   :  { %v1189_v34 = vadd.f32 %v1188_v33, %v1042_v32  ;;  %v2116_v35 = vpop.f32.mrb[25].mxu0 }
 0x8d0   :  { %v1191_v40 = vpop.f32.mrb[26].mxu0 }
 0x8d1   :  { %v2117_v41 = vpop.f32.mrb[27].mxu0  ;;  %v1199_v44 = vmul.f32 %v1189_v34, %v1189_v34  ;;  %v1196_v10 = vmul.f32 0.5, %v1189_v34 }
 0x8d3   :  { %v1202_v38 = vmul.f32 %v1199_v44, %v1189_v34 }
 0x8d5   :  { %v2269_v45 = vpop.eup %2268  ;;  %v1205_v55 = vmul.f32 0.044715, %v1202_v38 }
 0x8d6   :  { %v2271_v48 = vpop.eup %2270  ;;  %v1215_v52 = vadd.f32 1.0, %v2269_v45 }
 0x8d7   :  { %v1216_v4 = vadd.f32 1.0, %v2271_v48  ;;  %v1208_v0 = vadd.f32 %v1205_v55, %v1189_v34 }
 0x8d8   :  { %v1218_v53 = vmul.f32 %v1215_v52, %v1194_v50 }
 0x8d9   :  { %v1219_v54 = vmul.f32 %v1216_v4, %v1195_v3  ;;  %v1211_v59 = vmul.f32 0.7978846, %v1208_v0 }
 0x8da   :  { %v1270_v30 = vpack.c.bf16 %v1218_v53, %v1218_v53 }
 0x8db   :  { %v1271_v2 = vpack.c.bf16 %v1219_v54, %v1219_v54  ;;  %2272 = vtanh.f32 %v1211_v59 }
 0x8dd   :  { %1556 = vmatprep.mubr.bf16.mxu1 %v1271_v2 }
 0x8de   :  { %1557 = vmatmul.mubr.bf16.vlgmr.msra.gmra.mrb[16].mxu1 %v1270_v30 }
 0x8df   :  { %1566 = vmatpush1.bf16.msra.mxu1 %v2218_v37  ;;  %1597 = vmatprep.mubr.bf16.mxu1 %v2314_v43 }
 0x8e0   :  { %1567 = vmatprep.subr.bf16.mxu1 %v2223_v56 }
 0x8e3   :  { %1568 = vmatpush1.bf16.msra.mxu1 %v2221_v57 }
 0x8e4   :  { %1569 = vmatprep.subr.bf16.mxu1 %v2226_v58 }
 0x8e5   :  { %v2273_v6 = vpop.eup %2272 }
 0x8e6   :  { %v1217_v9 = vadd.f32 1.0, %v2273_v6 }
 0x8e7   :  { %1570 = vmatpush1.bf16.msra.mxu1 %v2224_v46 }
 0x8e8   :  { %1571 = vmatprep.subr.bf16.mxu1 %v2229_v60  ;;  %v1220_v12 = vmul.f32 %v1217_v9, %v1196_v10 }
 0x8ea   :  { %v1272_v13 = vpack.c.bf16 %v1220_v12, %v1220_v12 }
 0x8eb   :  { %1572 = vmatpush1.bf16.msra.mxu1 %v2227_v61 }
 0x8ec   :  { %1573 = vmatprep.subr.bf16.mxu1 %v2232_v63 }
 0x8ef   :  { %1574 = vmatpush1.bf16.msra.mxu1 %v2230_v51 }
 0x8f0   :  { %1575 = vmatprep.subr.bf16.mxu1 %v2235_v49 }
 0x8f3   :  { %1576 = vmatpush1.bf16.msra.mxu1 %v2233_v1 }
 0x8f4   :  { %1577 = vmatprep.subr.bf16.mxu1 %v2238_v5 }
 0x8f7   :  { %1578 = vmatpush1.bf16.msra.mxu1 %v2236_v7 }
 0x8f8   :  { %1579 = vmatprep.subr.bf16.mxu1 %v2241_v8 }
 0x8fb   :  { %1580 = vmatpush1.bf16.msra.mxu1 %v2239_v11 }
 0x8fe   :  { %1598 = vmatmul.mubr.bf16.vlgmr.msra.gmra.mrb[16].mxu1 %v1272_v13 }
 0x9d1   :  { %v1599_v17 = vpop.f32.mrb[16].mxu1 }
 0x9d2   :  { %v2118_v18 = vadd.f32 %v1599_v17, %v1277_v47  ;;  %v1601_v19 = vpop.f32.mrb[17].mxu1 }
 0x9d3   :  { %v2119_v20 = vadd.f32 %v1601_v19, %v1281_v16  ;;  %v1603_v21 = vpop.f32.mrb[18].mxu1 }
 0x9d4   :  { %v1604_v22 = vpop.f32.mrb[19].mxu1  ;;  %v1631_v23 = vpack.c.bf16 %v2118_v18, %v2118_v18 }
 0x9d5   :  { %v1632_v43 = vpack.c.bf16 %v2119_v20, %v2119_v20 }
 0x9d7   :  { %1997 = vmatprep.mubr.msk.bf16.mxu0 %vm365_vm3, %v1632_v43 }
 0x9d8   :  { %1747 = vmatmul.mubr.bf16.vlgmr.msra.gmra.mrb[28].mxu0 %v1631_v23 }
 0xaab   :  { %v1748_v42 = vpop.f32.mrb[28].mxu0 }
 0xaac   :  { %v1749_v26 = vadd.f32 %v1984_v39, %v1748_v42  ;;  %v1750_v27 = vpop.f32.mrb[29].mxu0 }
 0xaad   :  { %v1751_v36 = vpop.f32.mrb[30].mxu0 }
 0xaae   :  { %v1752_v28 = vpop.f32.mrb[31].mxu0  ;;  %v1797_v29 = vsel %vm2976_vm6, %v1749_v26, -1e+30  ;;  %v1756_v31 = vmul.f32 %v1749_v26, %v1749_v26  ;;  %v1786_v50 = vand.u32 2147483647, %v1749_v26  ;;  %v1785_v49 = vmax.f32 %v1749_v26, 0.0 }
 0xaaf   :  { %1798 = vmax.xlane.f32.xlu0 %v1797_v29 }
 0xab0   :  { %v1760_v33 = vsel %vm1758_vm9, %v1756_v31, 0.0  ;;  %v1769_v35 = vsel %vm2987_vm12, %v1756_v31, 0.0  ;;  %v1778_v40 = vsel %vm2995_vm13, %v1756_v31, 0.0  ;;  %v1787_v52 = vsub.f32 0.0, %v1786_v50 }
 0xab1   :  { %1761 = vadd.xlane.f32.xlu1 %v1760_v33 }
 0xab2   :  { %v1788_v38 = vmul.f32 1.442695, %v1787_v52 }
 0xab3   :  { %1770 = vadd.xlane.f32.xlu0 %v1769_v35 }
 0xab5   :  { %1779 = vadd.xlane.f32.xlu1 %v1778_v40 }
 0xb3c   :  { %v1799_v41 = vpop.xlane.xlu0 %1798 }
 0xb3d   :  { %v1800_v44 = vsub.f32 %v1797_v29, %v1799_v41 }
 0xb3e   :  { %v1762_v3 = vpop.xlane.xlu1 %1761 }
 0xb3f   :  { %v1801_v45 = vmul.f32 1.442695, %v1800_v44  ;;  %v1763_v4 = vadd.f32 1e-12, %v1762_v3 }
 0xb40   :  { %v1771_v53 = vpop.xlane.xlu0 %1770 }
 0xb41   :  { %2274 = vpow2.f32 %v1801_v45  ;;  %v1772_v55 = vadd.f32 1e-12, %v1771_v53 }
 0xb42   :  { %2276 = vpow2.f32 %v1788_v38  ;;  %v1780_v2 = vpop.xlane.xlu1 %1779 }
 0xb43   :  { %2278 = vrsqrt.f32 %v1763_v4  ;;  %v1781_v30 = vadd.f32 1e-12, %v1780_v2 }
 0xb44   :  { %2280 = vrsqrt.f32 %v1772_v55 }
 0xb4b   :  { %v2275_v48 = vpop.eup %2274 }
 0xb4c   :  { %1803 = vadd.xlane.f32.xlu0 %v2275_v48  ;;  %v2277_v54 = vpop.eup %2276 }
 0xb4d   :  { %v1790_v37 = vadd.f32 1.0, %v2277_v54  ;;  %v2279_v0 = vpop.eup %2278 }
 0xb4e   :  { %v2281_v57 = vpop.eup %2280  ;;  %v1765_v58 = vsel %vm1758_vm9, %v2279_v0, 1.0 }
 0xb4f   :  { %2282 = vlog2.f32 %v1790_v37  ;;  %v1774_v60 = vsel %vm2987_vm12, %v2281_v57, %v1765_v58 }
 0xb50   :  { %2284 = vrsqrt.f32 %v1781_v30 }
 0xb59   :  { %v2283_v59 = vpop.eup %2282 }
 0xb5a   :  { %v2285_v46 = vpop.eup %2284  ;;  %v1792_v61 = vmul.f32 0.6931472, %v2283_v59 }
 0xb5b   :  { %v1783_v51 = vsel %vm2995_vm13, %v2285_v46, %v1774_v60 }
 0xb5c   :  { %v1793_v5 = vadd.f32 %v1792_v61, %v1785_v49  ;;  %v1784_v6 = vmul.f32 %v1783_v51, %v1749_v26 }
 0xbd9   :  { %v1804_v56 = vpop.xlane.xlu0 %1803 }
 0xbda   :  { %2286 = vrcp.f32 %v1804_v56 }
 0xbe4   :  { %v2287_v63 = vpop.eup %2286 }
 0xbe5   :  { %v1806_v1 = vmul.f32 %v2287_v63, %v2275_v48 }
 0xbe7   :  { %v1808_v7 = vsel %vm2976_vm6, %v1806_v1, 0.0 }
 0xbe8   :  { %v1809_v8 = vsel %vm1807_vm14, %v1793_v5, %v1808_v7 }
 0xbe9   :  { %v1810_v9 = vsel %vm1776_vm11, %v1784_v6, %v1809_v8 }
 0xbea   :  { %1811 = vst [vmem:[#allocation2] sm:$0xff] %v1810_v9 }
 0xbeb   :  { %2299 = shalt.err (!%p2296_p4)
}
 0xbec   :  { %s2300_s21 = scalar_lea.hbm %s3042_s16, 128 }
 0xbed   :  { %p2301_p5 = scmp.ne.s32.totalorder %s3042_s16, %s2300_s21  ;;  %p2304_p6 = scmp.lt.u32.totalorder %s2300_s21, %s3042_s16 }
 0xbef   :  { %p2306_p7 = pnand %p2304_p6, %p2301_p5 }
 0xbf1   :  { %2309 = shalt.err (!%p2306_p7)
}
 0xbf2   :  { %1821 = dma.vmem_to_hbm [thread:$0]  %s1819_s15, 128, %s3042_s16, [#allocation3]  }
 0xbf3   :  { %2310 = dma.done.wait [#allocation3], 128  }
 0xbf4   :  { %2311 = vsyncadd [#allocation3], 4294967168 }
 0xbf5   :  { %1825 = vsyncpa [#allocation3], 1 }

</bundles_post_ra>
